<compile_context>
chip_gen: v7x
topology: tpu7x:2x2x1
jax: 0.10.0
libtpu: 0.0.40
codegen_flags: <defaults>
</compile_context>

<pallas_src>
import math
from functools import partial

import jax
import jax.numpy as jnp
from jax import lax
from jax.experimental import pallas as pl
from jax.experimental.pallas import tpu as pltpu

# ----------------------------- config (small synthetic ESM-1) ----------------
VOCAB = 33          # ESM-1 alphabet size
PAD_IDX = 1         # esm1_alphabet.padding_idx
D = 32              # embed_dim
H = 4               # attention heads
DH = D // H         # head dim
FFN = 64            # ffn hidden dim
LAYERS = 2          # synthetic stand-in; repr_layers=[12] -> last layer output
MLP_HIDDEN = 512    # TAPE ValuePredictionHead SimpleMLP hidden size
HEAD_PAD = 128      # lane-dense padded width of the value-head output
EPS = 1e-5
MAX_LEN = 64


# ----------------------------- in-kernel math helpers -------------------------
def _erf_f32(x):
    # Abramowitz & Stegun 7.1.26 polynomial erf (exp/mul/add/select only).
    a1, a2, a3, a4, a5 = 0.254829592, -0.284496736, 1.421413741, -1.453152027, 1.061405429
    p = 0.3275911
    sgn = jnp.where(x >= 0.0, 1.0, -1.0)
    ax = jnp.abs(x)
    t = 1.0 / (1.0 + p * ax)
    poly = ((((a5 * t + a4) * t + a3) * t + a2) * t + a1) * t
    return sgn * (1.0 - poly * jnp.exp(-ax * ax))


def _gelu_exact(x):
    # torch.nn.functional.gelu (exact erf form).
    return 0.5 * x * (1.0 + _erf_f32(x * (1.0 / math.sqrt(2.0))))


def _layer_norm(x, g, b):
    mu = jnp.mean(x, axis=-1, keepdims=True)
    var = jnp.mean(jnp.square(x - mu), axis=-1, keepdims=True)
    return (x - mu) * jax.lax.rsqrt(var + EPS) * g + b


# ----------------------------- fully fused forward kernel ---------------------
def _fused_kernel(ids_ref, idcol_ref, sel_ref, tokemb_ref, posemb_ref,
                  ln1g_ref, ln1b_ref, wqkv_ref, bqkv_ref, wo_ref, bo_ref,
                  ln2g_ref, ln2b_ref, wfc1_ref, bfc1_ref, wfc2_ref, bfc2_ref,
                  lnfg_ref, lnfb_ref, w1_ref, b1_ref, w2_ref, b2_ref,
                  out_ref, x_ref, *, batch, seqlen):
    """One grid step == one pre-LN ESM TransformerLayer.

    x_ref is a VMEM scratch carry (persists across grid steps, never hits HBM).
    Layer 0 builds the embeddings; the last layer runs the value-head epilogue."""
    layer = pl.program_id(0)
    bl = batch * seqlen

    # ---------------- layer-0 prologue: embeddings + pad zeroing -------------
    @pl.when(layer == 0)
    def _():
        # Gather-as-matmul: one_hot(ids) @ embed_tokens  (exact, MXU-friendly).
        iota_v = lax.broadcasted_iota(jnp.int32, (bl, VOCAB), 1)
        onehot = (iota_v == idcol_ref[...]).astype(jnp.float32)          # (B*L, V)
        tok = jnp.dot(onehot, tokemb_ref[...],
                      preferred_element_type=jnp.float32) * math.sqrt(D)  # (B*L, D)
        pos = posemb_ref[0:seqlen, :]                                     # (L, D) static slice
        x0 = (tok.reshape(batch, seqlen, D) + pos[None]).reshape(bl, D)
        padf = (idcol_ref[...] == PAD_IDX).astype(jnp.float32)            # (B*L, 1)
        x_ref[...] = x0 * (1.0 - padf)                                    # zero padded embeddings

    # additive key-padding mask, rebuilt each layer (2 tiny VPU ops)
    bias = jnp.where(ids_ref[...] == PAD_IDX, -1e9, 0.0).astype(jnp.float32)  # (B, L)
    bias3 = bias[:, None, :]                                                  # (B, 1, L)

    x = x_ref[...]                                                            # (B*L, D) f32 carry

    # ---------------- self-attention block (pre-LN) ---------------------------
    h_ln = _layer_norm(x, ln1g_ref[...], ln1b_ref[...])
    h_bf = h_ln.astype(jnp.bfloat16)
    scale = 1.0 / math.sqrt(DH)
    attn = jnp.zeros((bl, D), jnp.float32)
    for hd in range(H):            # static unroll; per-head weights -> no lane slicing/concat
        q = jnp.dot(h_bf, wqkv_ref[hd], preferred_element_type=jnp.float32) + bqkv_ref[hd]
        k = jnp.dot(h_bf, wqkv_ref[H + hd], preferred_element_type=jnp.float32) + bqkv_ref[H + hd]
        v = jnp.dot(h_bf, wqkv_ref[2 * H + hd], preferred_element_type=jnp.float32) + bqkv_ref[2 * H + hd]
        q3 = q.reshape(batch, seqlen, DH).astype(jnp.bfloat16)
        k3 = k.reshape(batch, seqlen, DH).astype(jnp.bfloat16)
        v3 = v.reshape(batch, seqlen, DH).astype(jnp.bfloat16)
        s = jnp.einsum('bqd,bkd->bqk', q3, k3,
                       preferred_element_type=jnp.float32)                # (B, L, L) f32
        s = s * scale + bias3
        m = jnp.max(s, axis=-1, keepdims=True)
        p = jnp.exp(s - m)
        p = p / jnp.sum(p, axis=-1, keepdims=True)                        # exact softmax
        o = jnp.einsum('bqk,bkd->bqd', p.astype(jnp.bfloat16), v3,
                       preferred_element_type=jnp.float32)                # (B, L, DH)
        # per-head output projection accumulated into (B*L, D) -> no lane concat
        attn = attn + jnp.dot(o.reshape(bl, DH).astype(jnp.bfloat16), wo_ref[hd],
                              preferred_element_type=jnp.float32)
    x = x + attn + bo_ref[...]

    # ---------------- feed-forward block (pre-LN) -----------------------------
    h2 = _layer_norm(x, ln2g_ref[...], ln2b_ref[...])
    f = jnp.dot(h2.astype(jnp.bfloat16), wfc1_ref[...],
                preferred_element_type=jnp.float32) + bfc1_ref[...]
    f = _gelu_exact(f)                                                    # exact gelu, f32
    f = jnp.dot(f.astype(jnp.bfloat16), wfc2_ref[...],
                preferred_element_type=jnp.float32) + bfc2_ref[...]
    x_new = x + f
    x_ref[...] = x_new

    # ---------------- last-layer epilogue: LN_f + CLS pool + value head ------
    @pl.when(layer == LAYERS - 1)
    def _():
        # CLS pooling via a (B, B*L) selector matmul (exact, avoids relayouts).
        cls = jnp.dot(sel_ref[...], x_new, preferred_element_type=jnp.float32)   # (B, D)
        cf = _layer_norm(cls, lnfg_ref[...], lnfb_ref[...])
        h1 = jnp.dot(cf.astype(jnp.bfloat16), w1_ref[...],
                     preferred_element_type=jnp.float32) + b1_ref[...]
        h1 = jnp.maximum(h1, 0.0)                                               # ReLU
        out_ref[...] = jnp.dot(h1.astype(jnp.bfloat16), w2_ref[...],
                               preferred_element_type=jnp.float32) + b2_ref[...]  # (B, 128)


def fused_forward(params, input_ids):
    """Whole ProteinBertForValuePrediction forward in one pallas_call."""
    bp, pp = params["bert"], params["predict"]
    lp = bp["layers"]
    batch, seqlen = input_ids.shape
    assert seqlen <= MAX_LEN
    bl = batch * seqlen

    ids = input_ids.astype(jnp.int32)                    # (B, L)
    ids_col = ids.reshape(bl, 1)                         # (B*L, 1) for one-hot / pad mask
    cls_sel = jax.nn.one_hot(jnp.arange(batch) * seqlen, bl,
                             dtype=jnp.float32)          # (B, B*L) CLS row selector

    c2 = lambda l: (0, 0)
    l3 = lambda l: (l, 0, 0)
    l4 = lambda l: (l, 0, 0, 0)

    grid_spec = pltpu.PrefetchScalarGridSpec(
        num_scalar_prefetch=0,
        grid=(LAYERS,),
        in_specs=[
            pl.BlockSpec((batch, seqlen), c2),                       # input_ids
            pl.BlockSpec((bl, 1), c2),                               # ids as column
            pl.BlockSpec((batch, bl), c2),                           # CLS selector
            pl.BlockSpec((VOCAB, D), c2),                            # token embeddings
            pl.BlockSpec((MAX_LEN, D), c2),                          # position embeddings
            pl.BlockSpec((pl.Squeezed(), 1, D), l3),                 # ln1_g
            pl.BlockSpec((pl.Squeezed(), 1, D), l3),                 # ln1_b
            pl.BlockSpec((pl.Squeezed(), 3 * H, D, DH), l4),         # wqkv (per-head q|k|v)
            pl.BlockSpec((pl.Squeezed(), 3 * H, 1, DH), l4),         # bqkv
            pl.BlockSpec((pl.Squeezed(), H, DH, D), l4),             # wo (per-head)
            pl.BlockSpec((pl.Squeezed(), 1, D), l3),                 # bo
            pl.BlockSpec((pl.Squeezed(), 1, D), l3),                 # ln2_g
            pl.BlockSpec((pl.Squeezed(), 1, D), l3),                 # ln2_b
            pl.BlockSpec((pl.Squeezed(), D, FFN), l3),               # w_fc1
            pl.BlockSpec((pl.Squeezed(), 1, FFN), l3),               # b_fc1
            pl.BlockSpec((pl.Squeezed(), FFN, D), l3),               # w_fc2
            pl.BlockSpec((pl.Squeezed(), 1, D), l3),                 # b_fc2
            pl.BlockSpec((1, D), c2),                                # ln_f_g
            pl.BlockSpec((1, D), c2),                                # ln_f_b
            pl.BlockSpec((D, MLP_HIDDEN), c2),                       # head w1
            pl.BlockSpec((1, MLP_HIDDEN), c2),                       # head b1
            pl.BlockSpec((MLP_HIDDEN, HEAD_PAD), c2),                # head w2 (padded)
            pl.BlockSpec((1, HEAD_PAD), c2),                         # head b2 (padded)
        ],
        out_specs=pl.BlockSpec((batch, HEAD_PAD), c2),               # lane-dense head output
        scratch_shapes=[pltpu.VMEM((bl, D), jnp.float32)],           # activation carry
    )
    return pl.pallas_call(
        partial(_fused_kernel, batch=batch, seqlen=seqlen),
        out_shape=jax.ShapeDtypeStruct((batch, HEAD_PAD), jnp.float32),
        grid_spec=grid_spec,
        compiler_params=pltpu.CompilerParams(
            dimension_semantics=("arbitrary",),       # layer loop is sequential (carry dep)
            vmem_limit_bytes=32 * 1024 * 1024,        # explicit scoped-VMEM budget (v5e/v7x)
        ),
    )(ids, ids_col, cls_sel, bp["embed_tokens"], bp["embed_positions"],
      lp["ln1_g"], lp["ln1_b"], lp["wqkv"], lp["bqkv"], lp["wo"], lp["bo"],
      lp["ln2_g"], lp["ln2_b"], lp["w_fc1"], lp["b_fc1"], lp["w_fc2"], lp["b_fc2"],
      bp["ln_f_g"], bp["ln_f_b"], pp["w1"], pp["b1"], pp["w2"], pp["b2"])


# ----------------------------- model glue -------------------------------------
def protein_bert_for_value_prediction(params, input_ids, targets=None):
    # Pooler('cls'): the reference literally indexes last_hidden[:, 0, 0]; the
    # downstream Linear(embed_dim, 512) needs the full CLS vector, so we keep the
    # shape-consistent [:, 0, :] interpretation (CLS-token representation).
    # TODO(synk): literal `[:, 0, 0]` yields a (B,) scalar the value head cannot consume.
    head_out = fused_forward(params, input_ids)            # (B, HEAD_PAD) lane-dense
    value_pred = head_out[:, :1]                            # (B, 1); column 0 is the value
    outputs = (value_pred,)
    if targets is not None:
        loss = jnp.mean((value_pred - targets) ** 2)        # nn.MSELoss()
        outputs = (loss,) + outputs
    return outputs


# ----------------------------- deterministic init -----------------------------
def init_params(key):
    def nrm(k, shape, std=0.02, dtype=jnp.float32):
        return (std * jax.random.normal(k, shape)).astype(dtype)

    keys = iter(jax.random.split(key, 64))
    # Per-layer weights stacked over the layer axis; attention weights pre-split
    # per head so the kernel needs no lane-axis slicing/concatenation.
    layers = dict(
        ln1_g=jnp.ones((LAYERS, 1, D), jnp.float32),
        ln1_b=jnp.zeros((LAYERS, 1, D), jnp.float32),
        wqkv=nrm(next(keys), (LAYERS, 3 * H, D, DH), dtype=jnp.bfloat16),  # [q_h*, k_h*, v_h*]
        bqkv=jnp.zeros((LAYERS, 3 * H, 1, DH), jnp.float32),
        wo=nrm(next(keys), (LAYERS, H, DH, D), dtype=jnp.bfloat16),        # per-head out proj
        bo=jnp.zeros((LAYERS, 1, D), jnp.float32),
        ln2_g=jnp.ones((LAYERS, 1, D), jnp.float32),
        ln2_b=jnp.zeros((LAYERS, 1, D), jnp.float32),
        w_fc1=nrm(next(keys), (LAYERS, D, FFN), dtype=jnp.bfloat16),
        b_fc1=jnp.zeros((LAYERS, 1, FFN), jnp.float32),
        w_fc2=nrm(next(keys), (LAYERS, FFN, D), dtype=jnp.bfloat16),
        b_fc2=jnp.zeros((LAYERS, 1, D), jnp.float32),
    )
    bert = dict(
        embed_tokens=nrm(next(keys), (VOCAB, D)),
        embed_positions=nrm(next(keys), (MAX_LEN, D)),
        layers=layers,
        ln_f_g=jnp.ones((1, D), jnp.float32),
        ln_f_b=jnp.zeros((1, D), jnp.float32),
    )
    # value head: second matmul zero-padded to a lane-dense (512, 128) output.
    w2 = nrm(next(keys), (MLP_HIDDEN, 1))
    predict = dict(
        w1=nrm(next(keys), (D, MLP_HIDDEN), dtype=jnp.bfloat16),
        b1=jnp.zeros((1, MLP_HIDDEN), jnp.float32),
        w2=jnp.pad(w2, ((0, 0), (0, HEAD_PAD - 1))).astype(jnp.bfloat16),
        b2=jnp.zeros((1, HEAD_PAD), jnp.float32),
    )
    return dict(bert=bert, predict=predict)


# ----------------------------- main -------------------------------------------
if __name__ == "__main__":
    key = jax.random.PRNGKey(0)
    params = init_params(key)

    B, L = 2, 8
    ids_key = jax.random.fold_in(key, 123)
    input_ids = jax.random.randint(ids_key, (B, L), minval=4, maxval=VOCAB, dtype=jnp.int32)
    input_ids = input_ids.at[:, 0].set(0)          # CLS/BOS token
    input_ids = input_ids.at[1, 6:].set(PAD_IDX)   # some padding to exercise the mask

    (value_pred,) = protein_bert_for_value_prediction(params, input_ids, targets=None)
    value_pred = jax.block_until_ready(value_pred)
    assert value_pred.shape == (B, 1) and value_pred.dtype == jnp.float32
    assert bool(jnp.all(jnp.isfinite(value_pred)))
    print("KERNEL_OK")
</pallas_src>

<mosaic_0001>
module attributes {stable_mosaic.version = 11 : i64} {
  func.func @_fused_kernel(%arg0: i32, %arg1: memref<2x8xi32, #tpu.memory_space<vmem>>, %arg2: memref<16x1xi32, #tpu.memory_space<vmem>>, %arg3: memref<2x16xf32, #tpu.memory_space<vmem>>, %arg4: memref<33x32xf32, #tpu.memory_space<vmem>>, %arg5: memref<64x32xf32, #tpu.memory_space<vmem>>, %arg6: memref<1x1x32xf32, #tpu.memory_space<vmem>>, %arg7: memref<1x1x32xf32, #tpu.memory_space<vmem>>, %arg8: memref<1x12x32x8xbf16, #tpu.memory_space<vmem>>, %arg9: memref<1x12x1x8xf32, #tpu.memory_space<vmem>>, %arg10: memref<1x4x8x32xbf16, #tpu.memory_space<vmem>>, %arg11: memref<1x1x32xf32, #tpu.memory_space<vmem>>, %arg12: memref<1x1x32xf32, #tpu.memory_space<vmem>>, %arg13: memref<1x1x32xf32, #tpu.memory_space<vmem>>, %arg14: memref<1x32x64xbf16, #tpu.memory_space<vmem>>, %arg15: memref<1x1x64xf32, #tpu.memory_space<vmem>>, %arg16: memref<1x64x32xbf16, #tpu.memory_space<vmem>>, %arg17: memref<1x1x32xf32, #tpu.memory_space<vmem>>, %arg18: memref<1x32xf32, #tpu.memory_space<vmem>>, %arg19: memref<1x32xf32, #tpu.memory_space<vmem>>, %arg20: memref<32x512xbf16, #tpu.memory_space<vmem>>, %arg21: memref<1x512xf32, #tpu.memory_space<vmem>>, %arg22: memref<512x128xbf16, #tpu.memory_space<vmem>>, %arg23: memref<1x128xf32, #tpu.memory_space<vmem>>, %arg24: memref<2x128xf32, #tpu.memory_space<vmem>>, %arg25: memref<16x32xf32, #tpu.memory_space<vmem>>) attributes {dimension_semantics = [#tpu.dimension_semantics<arbitrary>], iteration_bounds = array<i64: 2>, scalar_prefetch = 0 : i64, scratch_operands = 1 : i64, tpu.core_type = #tpu.core_type<tc>, window_params = [{pipeline_mode = #tpu.pipeline_mode<synchronous>, transform_indices = @transform_0, window_bounds = array<i64: 2, 8>}, {pipeline_mode = #tpu.pipeline_mode<synchronous>, transform_indices = @transform_1, window_bounds = array<i64: 16, 1>}, {pipeline_mode = #tpu.pipeline_mode<synchronous>, transform_indices = @transform_2, window_bounds = array<i64: 2, 16>}, {pipeline_mode = #tpu.pipeline_mode<synchronous>, transform_indices = @transform_3, window_bounds = array<i64: 33, 32>}, {pipeline_mode = #tpu.pipeline_mode<synchronous>, transform_indices = @transform_4, window_bounds = array<i64: 64, 32>}, {transform_indices = @transform_5, window_bounds = array<i64: 1, 1, 32>}, {transform_indices = @transform_6, window_bounds = array<i64: 1, 1, 32>}, {transform_indices = @transform_7, window_bounds = array<i64: 1, 12, 32, 8>}, {transform_indices = @transform_8, window_bounds = array<i64: 1, 12, 1, 8>}, {transform_indices = @transform_9, window_bounds = array<i64: 1, 4, 8, 32>}, {transform_indices = @transform_10, window_bounds = array<i64: 1, 1, 32>}, {transform_indices = @transform_11, window_bounds = array<i64: 1, 1, 32>}, {transform_indices = @transform_12, window_bounds = array<i64: 1, 1, 32>}, {transform_indices = @transform_13, window_bounds = array<i64: 1, 32, 64>}, {transform_indices = @transform_14, window_bounds = array<i64: 1, 1, 64>}, {transform_indices = @transform_15, window_bounds = array<i64: 1, 64, 32>}, {transform_indices = @transform_16, window_bounds = array<i64: 1, 1, 32>}, {pipeline_mode = #tpu.pipeline_mode<synchronous>, transform_indices = @transform_17, window_bounds = array<i64: 1, 32>}, {pipeline_mode = #tpu.pipeline_mode<synchronous>, transform_indices = @transform_18, window_bounds = array<i64: 1, 32>}, {pipeline_mode = #tpu.pipeline_mode<synchronous>, transform_indices = @transform_19, window_bounds = array<i64: 32, 512>}, {pipeline_mode = #tpu.pipeline_mode<synchronous>, transform_indices = @transform_20, window_bounds = array<i64: 1, 512>}, {pipeline_mode = #tpu.pipeline_mode<synchronous>, transform_indices = @transform_21, window_bounds = array<i64: 512, 128>}, {pipeline_mode = #tpu.pipeline_mode<synchronous>, transform_indices = @transform_22, window_bounds = array<i64: 1, 128>}, {pipeline_mode = #tpu.pipeline_mode<synchronous>, transform_indices = @transform_23, window_bounds = array<i64: 2, 128>}]} {
    %c0_i32 = arith.constant 0 : i32
    %0 = arith.cmpi eq, %arg0, %c0_i32 : i32
    %1 = arith.extui %0 : i1 to i32
    %c0_i32_0 = arith.constant 0 : i32
    %2 = arith.cmpi ne, %1, %c0_i32_0 : i32
    scf.if %2 {
      %328 = tpu.iota {dimensions = array<i32: 1>} : vector<16x33xi32>
      %c0_202 = arith.constant 0 : index
      %c0_203 = arith.constant 0 : index
      %329 = vector.load %arg2[%c0_202, %c0_203] : memref<16x1xi32, #tpu.memory_space<vmem>>, vector<16x1xi32>
      %330 = vector.broadcast %329 : vector<16x1xi32> to vector<16x33xi32>
      %331 = arith.cmpi eq, %328, %330 : vector<16x33xi32>
      %332 = arith.extui %331 : vector<16x33xi1> to vector<16x33xi32>
      %333 = arith.sitofp %332 : vector<16x33xi32> to vector<16x33xf32>
      %c0_204 = arith.constant 0 : index
      %c0_205 = arith.constant 0 : index
      %334 = vector.load %arg4[%c0_204, %c0_205] : memref<33x32xf32, #tpu.memory_space<vmem>>, vector<33x32xf32>
      %cst_206 = arith.constant dense<0.000000e+00> : vector<16x32xf32>
      %335 = tpu.matmul %333, %334, %cst_206 {dimension_numbers = #tpu.dot_dimension_numbers<[1], [0], [0], [1], [0, 0, 1, 1], [], []>} : vector<16x33xf32>, vector<33x32xf32>, vector<16x32xf32> -> vector<16x32xf32>
      %cst_207 = arith.constant 5.65685415 : f32
      %336 = vector.broadcast %cst_207 : f32 to vector<16x32xf32>
      %337 = arith.mulf %335, %336 : vector<16x32xf32>
      %c0_208 = arith.constant 0 : index
      %c0_209 = arith.constant 0 : index
      %338 = vector.load %arg5[%c0_208, %c0_209] : memref<64x32xf32, #tpu.memory_space<vmem>>, vector<8x32xf32>
      %339 = vector.shape_cast %337 : vector<16x32xf32> to vector<2x8x32xf32>
      %340 = vector.shape_cast %338 : vector<8x32xf32> to vector<1x8x32xf32>
      %341 = vector.broadcast %340 : vector<1x8x32xf32> to vector<2x8x32xf32>
      %342 = arith.addf %339, %341 : vector<2x8x32xf32>
      %343 = vector.shape_cast %342 : vector<2x8x32xf32> to vector<16x32xf32>
      %c0_210 = arith.constant 0 : index
      %c0_211 = arith.constant 0 : index
      %344 = vector.load %arg2[%c0_210, %c0_211] : memref<16x1xi32, #tpu.memory_space<vmem>>, vector<16x1xi32>
      %c1_i32_212 = arith.constant 1 : i32
      %345 = vector.broadcast %c1_i32_212 : i32 to vector<16x1xi32>
      %346 = arith.cmpi eq, %344, %345 : vector<16x1xi32>
      %347 = arith.extui %346 : vector<16x1xi1> to vector<16x1xi32>
      %348 = arith.sitofp %347 : vector<16x1xi32> to vector<16x1xf32>
      %cst_213 = arith.constant 1.000000e+00 : f32
      %349 = vector.broadcast %cst_213 : f32 to vector<16x1xf32>
      %350 = arith.subf %349, %348 : vector<16x1xf32>
      %351 = vector.broadcast %350 : vector<16x1xf32> to vector<16x32xf32>
      %352 = arith.mulf %343, %351 : vector<16x32xf32>
      %c0_214 = arith.constant 0 : index
      %c0_215 = arith.constant 0 : index
      %353 = vector.load %arg25[%c0_214, %c0_215] : memref<16x32xf32, #tpu.memory_space<vmem>>, vector<16x32xf32>
      tpu.vector_store %arg25[%c0_214, %c0_215], %352 {strides = array<i32>} : memref<16x32xf32, #tpu.memory_space<vmem>>, vector<16x32xf32>,
    } else {
    }
    %c0 = arith.constant 0 : index
    %c0_1 = arith.constant 0 : index
    %3 = vector.load %arg1[%c0, %c0_1] : memref<2x8xi32, #tpu.memory_space<vmem>>, vector<2x8xi32>
    %c1_i32 = arith.constant 1 : i32
    %4 = vector.broadcast %c1_i32 : i32 to vector<2x8xi32>
    %5 = arith.cmpi eq, %3, %4 : vector<2x8xi32>
    %cst = arith.constant -1.000000e+09 : f32
    %cst_2 = arith.constant 0.000000e+00 : f32
    %6 = vector.broadcast %cst : f32 to vector<2x8xf32>
    %7 = vector.broadcast %cst_2 : f32 to vector<2x8xf32>
    %8 = arith.select %5, %6, %7 : vector<2x8xi1>, vector<2x8xf32>
    %9 = vector.shape_cast %8 : vector<2x8xf32> to vector<2x1x8xf32>
    %c0_3 = arith.constant 0 : index
    %c0_4 = arith.constant 0 : index
    %10 = vector.load %arg25[%c0_3, %c0_4] : memref<16x32xf32, #tpu.memory_space<vmem>>, vector<16x32xf32>
    %c0_5 = arith.constant 0 : index
    %c0_6 = arith.constant 0 : index
    %c0_7 = arith.constant 0 : index
    %11 = vector.load %arg6[%c0_5, %c0_6, %c0_7] : memref<1x1x32xf32, #tpu.memory_space<vmem>>, vector<1x1x32xf32>
    %12 = vector.shape_cast %11 : vector<1x1x32xf32> to vector<1x32xf32>
    %c0_8 = arith.constant 0 : index
    %c0_9 = arith.constant 0 : index
    %c0_10 = arith.constant 0 : index
    %13 = vector.load %arg7[%c0_8, %c0_9, %c0_10] : memref<1x1x32xf32, #tpu.memory_space<vmem>>, vector<1x1x32xf32>
    %14 = vector.shape_cast %13 : vector<1x1x32xf32> to vector<1x32xf32>
    %cst_11 = arith.constant dense<0.000000e+00> : vector<16xf32>
    %15 = vector.multi_reduction <add>, %10, %cst_11 [1] : vector<16x32xf32> to vector<16xf32>
    %16 = vector.shape_cast %15 : vector<16xf32> to vector<16x1xf32>
    %cst_12 = arith.constant 3.200000e+01 : f32
    %17 = vector.broadcast %cst_12 : f32 to vector<16x1xf32>
    %18 = arith.divf %16, %17 : vector<16x1xf32>
    %19 = vector.broadcast %18 : vector<16x1xf32> to vector<16x32xf32>
    %20 = arith.subf %10, %19 : vector<16x32xf32>
    %21 = arith.mulf %20, %20 : vector<16x32xf32>
    %cst_13 = arith.constant dense<0.000000e+00> : vector<16xf32>
    %22 = vector.multi_reduction <add>, %21, %cst_13 [1] : vector<16x32xf32> to vector<16xf32>
    %23 = vector.shape_cast %22 : vector<16xf32> to vector<16x1xf32>
    %cst_14 = arith.constant 3.200000e+01 : f32
    %24 = vector.broadcast %cst_14 : f32 to vector<16x1xf32>
    %25 = arith.divf %23, %24 : vector<16x1xf32>
    %26 = vector.broadcast %18 : vector<16x1xf32> to vector<16x32xf32>
    %27 = arith.subf %10, %26 : vector<16x32xf32>
    %cst_15 = arith.constant 9.99999974E-6 : f32
    %28 = vector.broadcast %cst_15 : f32 to vector<16x1xf32>
    %29 = arith.addf %25, %28 : vector<16x1xf32>
    %30 = math.rsqrt %29 : vector<16x1xf32>
    %31 = vector.broadcast %30 : vector<16x1xf32> to vector<16x32xf32>
    %32 = arith.mulf %27, %31 : vector<16x32xf32>
    %33 = vector.broadcast %12 : vector<1x32xf32> to vector<16x32xf32>
    %34 = arith.mulf %32, %33 : vector<16x32xf32>
    %35 = vector.broadcast %14 : vector<1x32xf32> to vector<16x32xf32>
    %36 = arith.addf %34, %35 : vector<16x32xf32>
    %37 = arith.truncf %36 : vector<16x32xf32> to vector<16x32xbf16>
    %cst_16 = arith.constant 0.000000e+00 : f32
    %38 = vector.broadcast %cst_16 : f32 to vector<16x32xf32>
    %c0_17 = arith.constant 0 : index
    %c0_18 = arith.constant 0 : index
    %c0_19 = arith.constant 0 : index
    %c0_20 = arith.constant 0 : index
    %39 = vector.load %arg8[%c0_17, %c0_18, %c0_19, %c0_20] : memref<1x12x32x8xbf16, #tpu.memory_space<vmem>>, vector<1x1x32x8xbf16>
    %40 = vector.shape_cast %39 : vector<1x1x32x8xbf16> to vector<32x8xbf16>
    %cst_21 = arith.constant dense<0.000000e+00> : vector<16x8xf32>
    %41 = tpu.matmul %37, %40, %cst_21 {dimension_numbers = #tpu.dot_dimension_numbers<[1], [0], [0], [1], [0, 0, 1, 1], [], []>} : vector<16x32xbf16>, vector<32x8xbf16>, vector<16x8xf32> -> vector<16x8xf32>
    %c0_22 = arith.constant 0 : index
    %c0_23 = arith.constant 0 : index
    %c0_24 = arith.constant 0 : index
    %c0_25 = arith.constant 0 : index
    %42 = vector.load %arg9[%c0_22, %c0_23, %c0_24, %c0_25] : memref<1x12x1x8xf32, #tpu.memory_space<vmem>>, vector<1x1x1x8xf32>
    %43 = vector.shape_cast %42 : vector<1x1x1x8xf32> to vector<1x8xf32>
    %44 = vector.broadcast %43 : vector<1x8xf32> to vector<16x8xf32>
    %45 = arith.addf %41, %44 : vector<16x8xf32>
    %c0_26 = arith.constant 0 : index
    %c4 = arith.constant 4 : index
    %c0_27 = arith.constant 0 : index
    %c0_28 = arith.constant 0 : index
    %46 = vector.load %arg8[%c0_26, %c4, %c0_27, %c0_28] : memref<1x12x32x8xbf16, #tpu.memory_space<vmem>>, vector<1x1x32x8xbf16>
    %47 = vector.shape_cast %46 : vector<1x1x32x8xbf16> to vector<32x8xbf16>
    %cst_29 = arith.constant dense<0.000000e+00> : vector<16x8xf32>
    %48 = tpu.matmul %37, %47, %cst_29 {dimension_numbers = #tpu.dot_dimension_numbers<[1], [0], [0], [1], [0, 0, 1, 1], [], []>} : vector<16x32xbf16>, vector<32x8xbf16>, vector<16x8xf32> -> vector<16x8xf32>
    %c0_30 = arith.constant 0 : index
    %c4_31 = arith.constant 4 : index
    %c0_32 = arith.constant 0 : index
    %c0_33 = arith.constant 0 : index
    %49 = vector.load %arg9[%c0_30, %c4_31, %c0_32, %c0_33] : memref<1x12x1x8xf32, #tpu.memory_space<vmem>>, vector<1x1x1x8xf32>
    %50 = vector.shape_cast %49 : vector<1x1x1x8xf32> to vector<1x8xf32>
    %51 = vector.broadcast %50 : vector<1x8xf32> to vector<16x8xf32>
    %52 = arith.addf %48, %51 : vector<16x8xf32>
    %c0_34 = arith.constant 0 : index
    %c8 = arith.constant 8 : index
    %c0_35 = arith.constant 0 : index
    %c0_36 = arith.constant 0 : index
    %53 = vector.load %arg8[%c0_34, %c8, %c0_35, %c0_36] : memref<1x12x32x8xbf16, #tpu.memory_space<vmem>>, vector<1x1x32x8xbf16>
    %54 = vector.shape_cast %53 : vector<1x1x32x8xbf16> to vector<32x8xbf16>
    %cst_37 = arith.constant dense<0.000000e+00> : vector<16x8xf32>
    %55 = tpu.matmul %37, %54, %cst_37 {dimension_numbers = #tpu.dot_dimension_numbers<[1], [0], [0], [1], [0, 0, 1, 1], [], []>} : vector<16x32xbf16>, vector<32x8xbf16>, vector<16x8xf32> -> vector<16x8xf32>
    %c0_38 = arith.constant 0 : index
    %c8_39 = arith.constant 8 : index
    %c0_40 = arith.constant 0 : index
    %c0_41 = arith.constant 0 : index
    %56 = vector.load %arg9[%c0_38, %c8_39, %c0_40, %c0_41] : memref<1x12x1x8xf32, #tpu.memory_space<vmem>>, vector<1x1x1x8xf32>
    %57 = vector.shape_cast %56 : vector<1x1x1x8xf32> to vector<1x8xf32>
    %58 = vector.broadcast %57 : vector<1x8xf32> to vector<16x8xf32>
    %59 = arith.addf %55, %58 : vector<16x8xf32>
    %60 = vector.shape_cast %45 : vector<16x8xf32> to vector<2x8x8xf32>
    %61 = arith.truncf %60 : vector<2x8x8xf32> to vector<2x8x8xbf16>
    %62 = vector.shape_cast %52 : vector<16x8xf32> to vector<2x8x8xf32>
    %63 = arith.truncf %62 : vector<2x8x8xf32> to vector<2x8x8xbf16>
    %64 = vector.shape_cast %59 : vector<16x8xf32> to vector<2x8x8xf32>
    %65 = arith.truncf %64 : vector<2x8x8xf32> to vector<2x8x8xbf16>
    "tpu.trace_start"() <{level = 10 : i32, message = "bqd,bkd->bqk"}> : () -> ()
    %cst_42 = arith.constant dense<0.000000e+00> : vector<2x8x8xf32>
    %66 = tpu.matmul %61, %63, %cst_42 {dimension_numbers = #tpu.dot_dimension_numbers<[2], [2], [1], [1], [0, 0, 0, 1, 1, 1], [0], [0]>} : vector<2x8x8xbf16>, vector<2x8x8xbf16>, vector<2x8x8xf32> -> vector<2x8x8xf32>
    "tpu.trace_stop"() : () -> ()
    %cst_43 = arith.constant 0.353553385 : f32
    %67 = vector.broadcast %cst_43 : f32 to vector<2x8x8xf32>
    %68 = arith.mulf %66, %67 : vector<2x8x8xf32>
    %69 = vector.broadcast %9 : vector<2x1x8xf32> to vector<2x8x8xf32>
    %70 = arith.addf %68, %69 : vector<2x8x8xf32>
    %cst_44 = arith.constant dense<0xFF800000> : vector<2x8xf32>
    %71 = vector.multi_reduction <maximumf>, %70, %cst_44 [2] : vector<2x8x8xf32> to vector<2x8xf32>
    %72 = vector.shape_cast %71 : vector<2x8xf32> to vector<2x8x1xf32>
    %73 = vector.broadcast %72 : vector<2x8x1xf32> to vector<2x8x8xf32>
    %74 = arith.subf %70, %73 : vector<2x8x8xf32>
    %75 = math.exp %74 : vector<2x8x8xf32>
    %cst_45 = arith.constant dense<0.000000e+00> : vector<2x8xf32>
    %76 = vector.multi_reduction <add>, %75, %cst_45 [2] : vector<2x8x8xf32> to vector<2x8xf32>
    %77 = vector.shape_cast %76 : vector<2x8xf32> to vector<2x8x1xf32>
    %78 = vector.broadcast %77 : vector<2x8x1xf32> to vector<2x8x8xf32>
    %79 = arith.divf %75, %78 : vector<2x8x8xf32>
    %80 = arith.truncf %79 : vector<2x8x8xf32> to vector<2x8x8xbf16>
    "tpu.trace_start"() <{level = 10 : i32, message = "bqk,bkd->bqd"}> : () -> ()
    %cst_46 = arith.constant dense<0.000000e+00> : vector<2x8x8xf32>
    %81 = tpu.matmul %80, %65, %cst_46 {dimension_numbers = #tpu.dot_dimension_numbers<[2], [1], [1], [2], [0, 0, 0, 1, 1, 2], [0], [0]>} : vector<2x8x8xbf16>, vector<2x8x8xbf16>, vector<2x8x8xf32> -> vector<2x8x8xf32>
    "tpu.trace_stop"() : () -> ()
    %82 = vector.shape_cast %81 : vector<2x8x8xf32> to vector<16x8xf32>
    %83 = arith.truncf %82 : vector<16x8xf32> to vector<16x8xbf16>
    %c0_47 = arith.constant 0 : index
    %c0_48 = arith.constant 0 : index
    %c0_49 = arith.constant 0 : index
    %c0_50 = arith.constant 0 : index
    %84 = vector.load %arg10[%c0_47, %c0_48, %c0_49, %c0_50] : memref<1x4x8x32xbf16, #tpu.memory_space<vmem>>, vector<1x1x8x32xbf16>
    %85 = vector.shape_cast %84 : vector<1x1x8x32xbf16> to vector<8x32xbf16>
    %cst_51 = arith.constant dense<0.000000e+00> : vector<16x32xf32>
    %86 = tpu.matmul %83, %85, %cst_51 {dimension_numbers = #tpu.dot_dimension_numbers<[1], [0], [0], [1], [0, 0, 1, 1], [], []>} : vector<16x8xbf16>, vector<8x32xbf16>, vector<16x32xf32> -> vector<16x32xf32>
    %87 = arith.addf %38, %86 : vector<16x32xf32>
    %c0_52 = arith.constant 0 : index
    %c1 = arith.constant 1 : index
    %c0_53 = arith.constant 0 : index
    %c0_54 = arith.constant 0 : index
    %88 = vector.load %arg8[%c0_52, %c1, %c0_53, %c0_54] : memref<1x12x32x8xbf16, #tpu.memory_space<vmem>>, vector<1x1x32x8xbf16>
    %89 = vector.shape_cast %88 : vector<1x1x32x8xbf16> to vector<32x8xbf16>
    %cst_55 = arith.constant dense<0.000000e+00> : vector<16x8xf32>
    %90 = tpu.matmul %37, %89, %cst_55 {dimension_numbers = #tpu.dot_dimension_numbers<[1], [0], [0], [1], [0, 0, 1, 1], [], []>} : vector<16x32xbf16>, vector<32x8xbf16>, vector<16x8xf32> -> vector<16x8xf32>
    %c0_56 = arith.constant 0 : index
    %c1_57 = arith.constant 1 : index
    %c0_58 = arith.constant 0 : index
    %c0_59 = arith.constant 0 : index
    %91 = vector.load %arg9[%c0_56, %c1_57, %c0_58, %c0_59] : memref<1x12x1x8xf32, #tpu.memory_space<vmem>>, vector<1x1x1x8xf32>
    %92 = vector.shape_cast %91 : vector<1x1x1x8xf32> to vector<1x8xf32>
    %93 = vector.broadcast %92 : vector<1x8xf32> to vector<16x8xf32>
    %94 = arith.addf %90, %93 : vector<16x8xf32>
    %c0_60 = arith.constant 0 : index
    %c5 = arith.constant 5 : index
    %c0_61 = arith.constant 0 : index
    %c0_62 = arith.constant 0 : index
    %95 = vector.load %arg8[%c0_60, %c5, %c0_61, %c0_62] : memref<1x12x32x8xbf16, #tpu.memory_space<vmem>>, vector<1x1x32x8xbf16>
    %96 = vector.shape_cast %95 : vector<1x1x32x8xbf16> to vector<32x8xbf16>
    %cst_63 = arith.constant dense<0.000000e+00> : vector<16x8xf32>
    %97 = tpu.matmul %37, %96, %cst_63 {dimension_numbers = #tpu.dot_dimension_numbers<[1], [0], [0], [1], [0, 0, 1, 1], [], []>} : vector<16x32xbf16>, vector<32x8xbf16>, vector<16x8xf32> -> vector<16x8xf32>
    %c0_64 = arith.constant 0 : index
    %c5_65 = arith.constant 5 : index
    %c0_66 = arith.constant 0 : index
    %c0_67 = arith.constant 0 : index
    %98 = vector.load %arg9[%c0_64, %c5_65, %c0_66, %c0_67] : memref<1x12x1x8xf32, #tpu.memory_space<vmem>>, vector<1x1x1x8xf32>
    %99 = vector.shape_cast %98 : vector<1x1x1x8xf32> to vector<1x8xf32>
    %100 = vector.broadcast %99 : vector<1x8xf32> to vector<16x8xf32>
    %101 = arith.addf %97, %100 : vector<16x8xf32>
    %c0_68 = arith.constant 0 : index
    %c9 = arith.constant 9 : index
    %c0_69 = arith.constant 0 : index
    %c0_70 = arith.constant 0 : index
    %102 = vector.load %arg8[%c0_68, %c9, %c0_69, %c0_70] : memref<1x12x32x8xbf16, #tpu.memory_space<vmem>>, vector<1x1x32x8xbf16>
    %103 = vector.shape_cast %102 : vector<1x1x32x8xbf16> to vector<32x8xbf16>
    %cst_71 = arith.constant dense<0.000000e+00> : vector<16x8xf32>
    %104 = tpu.matmul %37, %103, %cst_71 {dimension_numbers = #tpu.dot_dimension_numbers<[1], [0], [0], [1], [0, 0, 1, 1], [], []>} : vector<16x32xbf16>, vector<32x8xbf16>, vector<16x8xf32> -> vector<16x8xf32>
    %c0_72 = arith.constant 0 : index
    %c9_73 = arith.constant 9 : index
    %c0_74 = arith.constant 0 : index
    %c0_75 = arith.constant 0 : index
    %105 = vector.load %arg9[%c0_72, %c9_73, %c0_74, %c0_75] : memref<1x12x1x8xf32, #tpu.memory_space<vmem>>, vector<1x1x1x8xf32>
    %106 = vector.shape_cast %105 : vector<1x1x1x8xf32> to vector<1x8xf32>
    %107 = vector.broadcast %106 : vector<1x8xf32> to vector<16x8xf32>
    %108 = arith.addf %104, %107 : vector<16x8xf32>
    %109 = vector.shape_cast %94 : vector<16x8xf32> to vector<2x8x8xf32>
    %110 = arith.truncf %109 : vector<2x8x8xf32> to vector<2x8x8xbf16>
    %111 = vector.shape_cast %101 : vector<16x8xf32> to vector<2x8x8xf32>
    %112 = arith.truncf %111 : vector<2x8x8xf32> to vector<2x8x8xbf16>
    %113 = vector.shape_cast %108 : vector<16x8xf32> to vector<2x8x8xf32>
    %114 = arith.truncf %113 : vector<2x8x8xf32> to vector<2x8x8xbf16>
    "tpu.trace_start"() <{level = 10 : i32, message = "bqd,bkd->bqk"}> : () -> ()
    %cst_76 = arith.constant dense<0.000000e+00> : vector<2x8x8xf32>
    %115 = tpu.matmul %110, %112, %cst_76 {dimension_numbers = #tpu.dot_dimension_numbers<[2], [2], [1], [1], [0, 0, 0, 1, 1, 1], [0], [0]>} : vector<2x8x8xbf16>, vector<2x8x8xbf16>, vector<2x8x8xf32> -> vector<2x8x8xf32>
    "tpu.trace_stop"() : () -> ()
    %cst_77 = arith.constant 0.353553385 : f32
    %116 = vector.broadcast %cst_77 : f32 to vector<2x8x8xf32>
    %117 = arith.mulf %115, %116 : vector<2x8x8xf32>
    %118 = vector.broadcast %9 : vector<2x1x8xf32> to vector<2x8x8xf32>
    %119 = arith.addf %117, %118 : vector<2x8x8xf32>
    %cst_78 = arith.constant dense<0xFF800000> : vector<2x8xf32>
    %120 = vector.multi_reduction <maximumf>, %119, %cst_78 [2] : vector<2x8x8xf32> to vector<2x8xf32>
    %121 = vector.shape_cast %120 : vector<2x8xf32> to vector<2x8x1xf32>
    %122 = vector.broadcast %121 : vector<2x8x1xf32> to vector<2x8x8xf32>
    %123 = arith.subf %119, %122 : vector<2x8x8xf32>
    %124 = math.exp %123 : vector<2x8x8xf32>
    %cst_79 = arith.constant dense<0.000000e+00> : vector<2x8xf32>
    %125 = vector.multi_reduction <add>, %124, %cst_79 [2] : vector<2x8x8xf32> to vector<2x8xf32>
    %126 = vector.shape_cast %125 : vector<2x8xf32> to vector<2x8x1xf32>
    %127 = vector.broadcast %126 : vector<2x8x1xf32> to vector<2x8x8xf32>
    %128 = arith.divf %124, %127 : vector<2x8x8xf32>
    %129 = arith.truncf %128 : vector<2x8x8xf32> to vector<2x8x8xbf16>
    "tpu.trace_start"() <{level = 10 : i32, message = "bqk,bkd->bqd"}> : () -> ()
    %cst_80 = arith.constant dense<0.000000e+00> : vector<2x8x8xf32>
    %130 = tpu.matmul %129, %114, %cst_80 {dimension_numbers = #tpu.dot_dimension_numbers<[2], [1], [1], [2], [0, 0, 0, 1, 1, 2], [0], [0]>} : vector<2x8x8xbf16>, vector<2x8x8xbf16>, vector<2x8x8xf32> -> vector<2x8x8xf32>
    "tpu.trace_stop"() : () -> ()
    %131 = vector.shape_cast %130 : vector<2x8x8xf32> to vector<16x8xf32>
    %132 = arith.truncf %131 : vector<16x8xf32> to vector<16x8xbf16>
    %c0_81 = arith.constant 0 : index
    %c1_82 = arith.constant 1 : index
    %c0_83 = arith.constant 0 : index
    %c0_84 = arith.constant 0 : index
    %133 = vector.load %arg10[%c0_81, %c1_82, %c0_83, %c0_84] : memref<1x4x8x32xbf16, #tpu.memory_space<vmem>>, vector<1x1x8x32xbf16>
    %134 = vector.shape_cast %133 : vector<1x1x8x32xbf16> to vector<8x32xbf16>
    %cst_85 = arith.constant dense<0.000000e+00> : vector<16x32xf32>
    %135 = tpu.matmul %132, %134, %cst_85 {dimension_numbers = #tpu.dot_dimension_numbers<[1], [0], [0], [1], [0, 0, 1, 1], [], []>} : vector<16x8xbf16>, vector<8x32xbf16>, vector<16x32xf32> -> vector<16x32xf32>
    %136 = arith.addf %87, %135 : vector<16x32xf32>
    %c0_86 = arith.constant 0 : index
    %c2 = arith.constant 2 : index
    %c0_87 = arith.constant 0 : index
    %c0_88 = arith.constant 0 : index
    %137 = vector.load %arg8[%c0_86, %c2, %c0_87, %c0_88] : memref<1x12x32x8xbf16, #tpu.memory_space<vmem>>, vector<1x1x32x8xbf16>
    %138 = vector.shape_cast %137 : vector<1x1x32x8xbf16> to vector<32x8xbf16>
    %cst_89 = arith.constant dense<0.000000e+00> : vector<16x8xf32>
    %139 = tpu.matmul %37, %138, %cst_89 {dimension_numbers = #tpu.dot_dimension_numbers<[1], [0], [0], [1], [0, 0, 1, 1], [], []>} : vector<16x32xbf16>, vector<32x8xbf16>, vector<16x8xf32> -> vector<16x8xf32>
    %c0_90 = arith.constant 0 : index
    %c2_91 = arith.constant 2 : index
    %c0_92 = arith.constant 0 : index
    %c0_93 = arith.constant 0 : index
    %140 = vector.load %arg9[%c0_90, %c2_91, %c0_92, %c0_93] : memref<1x12x1x8xf32, #tpu.memory_space<vmem>>, vector<1x1x1x8xf32>
    %141 = vector.shape_cast %140 : vector<1x1x1x8xf32> to vector<1x8xf32>
    %142 = vector.broadcast %141 : vector<1x8xf32> to vector<16x8xf32>
    %143 = arith.addf %139, %142 : vector<16x8xf32>
    %c0_94 = arith.constant 0 : index
    %c6 = arith.constant 6 : index
    %c0_95 = arith.constant 0 : index
    %c0_96 = arith.constant 0 : index
    %144 = vector.load %arg8[%c0_94, %c6, %c0_95, %c0_96] : memref<1x12x32x8xbf16, #tpu.memory_space<vmem>>, vector<1x1x32x8xbf16>
    %145 = vector.shape_cast %144 : vector<1x1x32x8xbf16> to vector<32x8xbf16>
    %cst_97 = arith.constant dense<0.000000e+00> : vector<16x8xf32>
    %146 = tpu.matmul %37, %145, %cst_97 {dimension_numbers = #tpu.dot_dimension_numbers<[1], [0], [0], [1], [0, 0, 1, 1], [], []>} : vector<16x32xbf16>, vector<32x8xbf16>, vector<16x8xf32> -> vector<16x8xf32>
    %c0_98 = arith.constant 0 : index
    %c6_99 = arith.constant 6 : index
    %c0_100 = arith.constant 0 : index
    %c0_101 = arith.constant 0 : index
    %147 = vector.load %arg9[%c0_98, %c6_99, %c0_100, %c0_101] : memref<1x12x1x8xf32, #tpu.memory_space<vmem>>, vector<1x1x1x8xf32>
    %148 = vector.shape_cast %147 : vector<1x1x1x8xf32> to vector<1x8xf32>
    %149 = vector.broadcast %148 : vector<1x8xf32> to vector<16x8xf32>
    %150 = arith.addf %146, %149 : vector<16x8xf32>
    %c0_102 = arith.constant 0 : index
    %c10 = arith.constant 10 : index
    %c0_103 = arith.constant 0 : index
    %c0_104 = arith.constant 0 : index
    %151 = vector.load %arg8[%c0_102, %c10, %c0_103, %c0_104] : memref<1x12x32x8xbf16, #tpu.memory_space<vmem>>, vector<1x1x32x8xbf16>
    %152 = vector.shape_cast %151 : vector<1x1x32x8xbf16> to vector<32x8xbf16>
    %cst_105 = arith.constant dense<0.000000e+00> : vector<16x8xf32>
    %153 = tpu.matmul %37, %152, %cst_105 {dimension_numbers = #tpu.dot_dimension_numbers<[1], [0], [0], [1], [0, 0, 1, 1], [], []>} : vector<16x32xbf16>, vector<32x8xbf16>, vector<16x8xf32> -> vector<16x8xf32>
    %c0_106 = arith.constant 0 : index
    %c10_107 = arith.constant 10 : index
    %c0_108 = arith.constant 0 : index
    %c0_109 = arith.constant 0 : index
    %154 = vector.load %arg9[%c0_106, %c10_107, %c0_108, %c0_109] : memref<1x12x1x8xf32, #tpu.memory_space<vmem>>, vector<1x1x1x8xf32>
    %155 = vector.shape_cast %154 : vector<1x1x1x8xf32> to vector<1x8xf32>
    %156 = vector.broadcast %155 : vector<1x8xf32> to vector<16x8xf32>
    %157 = arith.addf %153, %156 : vector<16x8xf32>
    %158 = vector.shape_cast %143 : vector<16x8xf32> to vector<2x8x8xf32>
    %159 = arith.truncf %158 : vector<2x8x8xf32> to vector<2x8x8xbf16>
    %160 = vector.shape_cast %150 : vector<16x8xf32> to vector<2x8x8xf32>
    %161 = arith.truncf %160 : vector<2x8x8xf32> to vector<2x8x8xbf16>
    %162 = vector.shape_cast %157 : vector<16x8xf32> to vector<2x8x8xf32>
    %163 = arith.truncf %162 : vector<2x8x8xf32> to vector<2x8x8xbf16>
    "tpu.trace_start"() <{level = 10 : i32, message = "bqd,bkd->bqk"}> : () -> ()
    %cst_110 = arith.constant dense<0.000000e+00> : vector<2x8x8xf32>
    %164 = tpu.matmul %159, %161, %cst_110 {dimension_numbers = #tpu.dot_dimension_numbers<[2], [2], [1], [1], [0, 0, 0, 1, 1, 1], [0], [0]>} : vector<2x8x8xbf16>, vector<2x8x8xbf16>, vector<2x8x8xf32> -> vector<2x8x8xf32>
    "tpu.trace_stop"() : () -> ()
    %cst_111 = arith.constant 0.353553385 : f32
    %165 = vector.broadcast %cst_111 : f32 to vector<2x8x8xf32>
    %166 = arith.mulf %164, %165 : vector<2x8x8xf32>
    %167 = vector.broadcast %9 : vector<2x1x8xf32> to vector<2x8x8xf32>
    %168 = arith.addf %166, %167 : vector<2x8x8xf32>
    %cst_112 = arith.constant dense<0xFF800000> : vector<2x8xf32>
    %169 = vector.multi_reduction <maximumf>, %168, %cst_112 [2] : vector<2x8x8xf32> to vector<2x8xf32>
    %170 = vector.shape_cast %169 : vector<2x8xf32> to vector<2x8x1xf32>
    %171 = vector.broadcast %170 : vector<2x8x1xf32> to vector<2x8x8xf32>
    %172 = arith.subf %168, %171 : vector<2x8x8xf32>
    %173 = math.exp %172 : vector<2x8x8xf32>
    %cst_113 = arith.constant dense<0.000000e+00> : vector<2x8xf32>
    %174 = vector.multi_reduction <add>, %173, %cst_113 [2] : vector<2x8x8xf32> to vector<2x8xf32>
    %175 = vector.shape_cast %174 : vector<2x8xf32> to vector<2x8x1xf32>
    %176 = vector.broadcast %175 : vector<2x8x1xf32> to vector<2x8x8xf32>
    %177 = arith.divf %173, %176 : vector<2x8x8xf32>
    %178 = arith.truncf %177 : vector<2x8x8xf32> to vector<2x8x8xbf16>
    "tpu.trace_start"() <{level = 10 : i32, message = "bqk,bkd->bqd"}> : () -> ()
    %cst_114 = arith.constant dense<0.000000e+00> : vector<2x8x8xf32>
    %179 = tpu.matmul %178, %163, %cst_114 {dimension_numbers = #tpu.dot_dimension_numbers<[2], [1], [1], [2], [0, 0, 0, 1, 1, 2], [0], [0]>} : vector<2x8x8xbf16>, vector<2x8x8xbf16>, vector<2x8x8xf32> -> vector<2x8x8xf32>
    "tpu.trace_stop"() : () -> ()
    %180 = vector.shape_cast %179 : vector<2x8x8xf32> to vector<16x8xf32>
    %181 = arith.truncf %180 : vector<16x8xf32> to vector<16x8xbf16>
    %c0_115 = arith.constant 0 : index
    %c2_116 = arith.constant 2 : index
    %c0_117 = arith.constant 0 : index
    %c0_118 = arith.constant 0 : index
    %182 = vector.load %arg10[%c0_115, %c2_116, %c0_117, %c0_118] : memref<1x4x8x32xbf16, #tpu.memory_space<vmem>>, vector<1x1x8x32xbf16>
    %183 = vector.shape_cast %182 : vector<1x1x8x32xbf16> to vector<8x32xbf16>
    %cst_119 = arith.constant dense<0.000000e+00> : vector<16x32xf32>
    %184 = tpu.matmul %181, %183, %cst_119 {dimension_numbers = #tpu.dot_dimension_numbers<[1], [0], [0], [1], [0, 0, 1, 1], [], []>} : vector<16x8xbf16>, vector<8x32xbf16>, vector<16x32xf32> -> vector<16x32xf32>
    %185 = arith.addf %136, %184 : vector<16x32xf32>
    %c0_120 = arith.constant 0 : index
    %c3 = arith.constant 3 : index
    %c0_121 = arith.constant 0 : index
    %c0_122 = arith.constant 0 : index
    %186 = vector.load %arg8[%c0_120, %c3, %c0_121, %c0_122] : memref<1x12x32x8xbf16, #tpu.memory_space<vmem>>, vector<1x1x32x8xbf16>
    %187 = vector.shape_cast %186 : vector<1x1x32x8xbf16> to vector<32x8xbf16>
    %cst_123 = arith.constant dense<0.000000e+00> : vector<16x8xf32>
    %188 = tpu.matmul %37, %187, %cst_123 {dimension_numbers = #tpu.dot_dimension_numbers<[1], [0], [0], [1], [0, 0, 1, 1], [], []>} : vector<16x32xbf16>, vector<32x8xbf16>, vector<16x8xf32> -> vector<16x8xf32>
    %c0_124 = arith.constant 0 : index
    %c3_125 = arith.constant 3 : index
    %c0_126 = arith.constant 0 : index
    %c0_127 = arith.constant 0 : index
    %189 = vector.load %arg9[%c0_124, %c3_125, %c0_126, %c0_127] : memref<1x12x1x8xf32, #tpu.memory_space<vmem>>, vector<1x1x1x8xf32>
    %190 = vector.shape_cast %189 : vector<1x1x1x8xf32> to vector<1x8xf32>
    %191 = vector.broadcast %190 : vector<1x8xf32> to vector<16x8xf32>
    %192 = arith.addf %188, %191 : vector<16x8xf32>
    %c0_128 = arith.constant 0 : index
    %c7 = arith.constant 7 : index
    %c0_129 = arith.constant 0 : index
    %c0_130 = arith.constant 0 : index
    %193 = vector.load %arg8[%c0_128, %c7, %c0_129, %c0_130] : memref<1x12x32x8xbf16, #tpu.memory_space<vmem>>, vector<1x1x32x8xbf16>
    %194 = vector.shape_cast %193 : vector<1x1x32x8xbf16> to vector<32x8xbf16>
    %cst_131 = arith.constant dense<0.000000e+00> : vector<16x8xf32>
    %195 = tpu.matmul %37, %194, %cst_131 {dimension_numbers = #tpu.dot_dimension_numbers<[1], [0], [0], [1], [0, 0, 1, 1], [], []>} : vector<16x32xbf16>, vector<32x8xbf16>, vector<16x8xf32> -> vector<16x8xf32>
    %c0_132 = arith.constant 0 : index
    %c7_133 = arith.constant 7 : index
    %c0_134 = arith.constant 0 : index
    %c0_135 = arith.constant 0 : index
    %196 = vector.load %arg9[%c0_132, %c7_133, %c0_134, %c0_135] : memref<1x12x1x8xf32, #tpu.memory_space<vmem>>, vector<1x1x1x8xf32>
    %197 = vector.shape_cast %196 : vector<1x1x1x8xf32> to vector<1x8xf32>
    %198 = vector.broadcast %197 : vector<1x8xf32> to vector<16x8xf32>
    %199 = arith.addf %195, %198 : vector<16x8xf32>
    %c0_136 = arith.constant 0 : index
    %c11 = arith.constant 11 : index
    %c0_137 = arith.constant 0 : index
    %c0_138 = arith.constant 0 : index
    %200 = vector.load %arg8[%c0_136, %c11, %c0_137, %c0_138] : memref<1x12x32x8xbf16, #tpu.memory_space<vmem>>, vector<1x1x32x8xbf16>
    %201 = vector.shape_cast %200 : vector<1x1x32x8xbf16> to vector<32x8xbf16>
    %cst_139 = arith.constant dense<0.000000e+00> : vector<16x8xf32>
    %202 = tpu.matmul %37, %201, %cst_139 {dimension_numbers = #tpu.dot_dimension_numbers<[1], [0], [0], [1], [0, 0, 1, 1], [], []>} : vector<16x32xbf16>, vector<32x8xbf16>, vector<16x8xf32> -> vector<16x8xf32>
    %c0_140 = arith.constant 0 : index
    %c11_141 = arith.constant 11 : index
    %c0_142 = arith.constant 0 : index
    %c0_143 = arith.constant 0 : index
    %203 = vector.load %arg9[%c0_140, %c11_141, %c0_142, %c0_143] : memref<1x12x1x8xf32, #tpu.memory_space<vmem>>, vector<1x1x1x8xf32>
    %204 = vector.shape_cast %203 : vector<1x1x1x8xf32> to vector<1x8xf32>
    %205 = vector.broadcast %204 : vector<1x8xf32> to vector<16x8xf32>
    %206 = arith.addf %202, %205 : vector<16x8xf32>
    %207 = vector.shape_cast %192 : vector<16x8xf32> to vector<2x8x8xf32>
    %208 = arith.truncf %207 : vector<2x8x8xf32> to vector<2x8x8xbf16>
    %209 = vector.shape_cast %199 : vector<16x8xf32> to vector<2x8x8xf32>
    %210 = arith.truncf %209 : vector<2x8x8xf32> to vector<2x8x8xbf16>
    %211 = vector.shape_cast %206 : vector<16x8xf32> to vector<2x8x8xf32>
    %212 = arith.truncf %211 : vector<2x8x8xf32> to vector<2x8x8xbf16>
    "tpu.trace_start"() <{level = 10 : i32, message = "bqd,bkd->bqk"}> : () -> ()
    %cst_144 = arith.constant dense<0.000000e+00> : vector<2x8x8xf32>
    %213 = tpu.matmul %208, %210, %cst_144 {dimension_numbers = #tpu.dot_dimension_numbers<[2], [2], [1], [1], [0, 0, 0, 1, 1, 1], [0], [0]>} : vector<2x8x8xbf16>, vector<2x8x8xbf16>, vector<2x8x8xf32> -> vector<2x8x8xf32>
    "tpu.trace_stop"() : () -> ()
    %cst_145 = arith.constant 0.353553385 : f32
    %214 = vector.broadcast %cst_145 : f32 to vector<2x8x8xf32>
    %215 = arith.mulf %213, %214 : vector<2x8x8xf32>
    %216 = vector.broadcast %9 : vector<2x1x8xf32> to vector<2x8x8xf32>
    %217 = arith.addf %215, %216 : vector<2x8x8xf32>
    %cst_146 = arith.constant dense<0xFF800000> : vector<2x8xf32>
    %218 = vector.multi_reduction <maximumf>, %217, %cst_146 [2] : vector<2x8x8xf32> to vector<2x8xf32>
    %219 = vector.shape_cast %218 : vector<2x8xf32> to vector<2x8x1xf32>
    %220 = vector.broadcast %219 : vector<2x8x1xf32> to vector<2x8x8xf32>
    %221 = arith.subf %217, %220 : vector<2x8x8xf32>
    %222 = math.exp %221 : vector<2x8x8xf32>
    %cst_147 = arith.constant dense<0.000000e+00> : vector<2x8xf32>
    %223 = vector.multi_reduction <add>, %222, %cst_147 [2] : vector<2x8x8xf32> to vector<2x8xf32>
    %224 = vector.shape_cast %223 : vector<2x8xf32> to vector<2x8x1xf32>
    %225 = vector.broadcast %224 : vector<2x8x1xf32> to vector<2x8x8xf32>
    %226 = arith.divf %222, %225 : vector<2x8x8xf32>
    %227 = arith.truncf %226 : vector<2x8x8xf32> to vector<2x8x8xbf16>
    "tpu.trace_start"() <{level = 10 : i32, message = "bqk,bkd->bqd"}> : () -> ()
    %cst_148 = arith.constant dense<0.000000e+00> : vector<2x8x8xf32>
    %228 = tpu.matmul %227, %212, %cst_148 {dimension_numbers = #tpu.dot_dimension_numbers<[2], [1], [1], [2], [0, 0, 0, 1, 1, 2], [0], [0]>} : vector<2x8x8xbf16>, vector<2x8x8xbf16>, vector<2x8x8xf32> -> vector<2x8x8xf32>
    "tpu.trace_stop"() : () -> ()
    %229 = vector.shape_cast %228 : vector<2x8x8xf32> to vector<16x8xf32>
    %230 = arith.truncf %229 : vector<16x8xf32> to vector<16x8xbf16>
    %c0_149 = arith.constant 0 : index
    %c3_150 = arith.constant 3 : index
    %c0_151 = arith.constant 0 : index
    %c0_152 = arith.constant 0 : index
    %231 = vector.load %arg10[%c0_149, %c3_150, %c0_151, %c0_152] : memref<1x4x8x32xbf16, #tpu.memory_space<vmem>>, vector<1x1x8x32xbf16>
    %232 = vector.shape_cast %231 : vector<1x1x8x32xbf16> to vector<8x32xbf16>
    %cst_153 = arith.constant dense<0.000000e+00> : vector<16x32xf32>
    %233 = tpu.matmul %230, %232, %cst_153 {dimension_numbers = #tpu.dot_dimension_numbers<[1], [0], [0], [1], [0, 0, 1, 1], [], []>} : vector<16x8xbf16>, vector<8x32xbf16>, vector<16x32xf32> -> vector<16x32xf32>
    %234 = arith.addf %185, %233 : vector<16x32xf32>
    %235 = arith.addf %10, %234 : vector<16x32xf32>
    %c0_154 = arith.constant 0 : index
    %c0_155 = arith.constant 0 : index
    %c0_156 = arith.constant 0 : index
    %236 = vector.load %arg11[%c0_154, %c0_155, %c0_156] : memref<1x1x32xf32, #tpu.memory_space<vmem>>, vector<1x1x32xf32>
    %237 = vector.shape_cast %236 : vector<1x1x32xf32> to vector<1x32xf32>
    %238 = vector.broadcast %237 : vector<1x32xf32> to vector<16x32xf32>
    %239 = arith.addf %235, %238 : vector<16x32xf32>
    %c0_157 = arith.constant 0 : index
    %c0_158 = arith.constant 0 : index
    %c0_159 = arith.constant 0 : index
    %240 = vector.load %arg12[%c0_157, %c0_158, %c0_159] : memref<1x1x32xf32, #tpu.memory_space<vmem>>, vector<1x1x32xf32>
    %241 = vector.shape_cast %240 : vector<1x1x32xf32> to vector<1x32xf32>
    %c0_160 = arith.constant 0 : index
    %c0_161 = arith.constant 0 : index
    %c0_162 = arith.constant 0 : index
    %242 = vector.load %arg13[%c0_160, %c0_161, %c0_162] : memref<1x1x32xf32, #tpu.memory_space<vmem>>, vector<1x1x32xf32>
    %243 = vector.shape_cast %242 : vector<1x1x32xf32> to vector<1x32xf32>
    %cst_163 = arith.constant dense<0.000000e+00> : vector<16xf32>
    %244 = vector.multi_reduction <add>, %239, %cst_163 [1] : vector<16x32xf32> to vector<16xf32>
    %245 = vector.shape_cast %244 : vector<16xf32> to vector<16x1xf32>
    %cst_164 = arith.constant 3.200000e+01 : f32
    %246 = vector.broadcast %cst_164 : f32 to vector<16x1xf32>
    %247 = arith.divf %245, %246 : vector<16x1xf32>
    %248 = vector.broadcast %247 : vector<16x1xf32> to vector<16x32xf32>
    %249 = arith.subf %239, %248 : vector<16x32xf32>
    %250 = arith.mulf %249, %249 : vector<16x32xf32>
    %cst_165 = arith.constant dense<0.000000e+00> : vector<16xf32>
    %251 = vector.multi_reduction <add>, %250, %cst_165 [1] : vector<16x32xf32> to vector<16xf32>
    %252 = vector.shape_cast %251 : vector<16xf32> to vector<16x1xf32>
    %cst_166 = arith.constant 3.200000e+01 : f32
    %253 = vector.broadcast %cst_166 : f32 to vector<16x1xf32>
    %254 = arith.divf %252, %253 : vector<16x1xf32>
    %255 = vector.broadcast %247 : vector<16x1xf32> to vector<16x32xf32>
    %256 = arith.subf %239, %255 : vector<16x32xf32>
    %cst_167 = arith.constant 9.99999974E-6 : f32
    %257 = vector.broadcast %cst_167 : f32 to vector<16x1xf32>
    %258 = arith.addf %254, %257 : vector<16x1xf32>
    %259 = math.rsqrt %258 : vector<16x1xf32>
    %260 = vector.broadcast %259 : vector<16x1xf32> to vector<16x32xf32>
    %261 = arith.mulf %256, %260 : vector<16x32xf32>
    %262 = vector.broadcast %241 : vector<1x32xf32> to vector<16x32xf32>
    %263 = arith.mulf %261, %262 : vector<16x32xf32>
    %264 = vector.broadcast %243 : vector<1x32xf32> to vector<16x32xf32>
    %265 = arith.addf %263, %264 : vector<16x32xf32>
    %266 = arith.truncf %265 : vector<16x32xf32> to vector<16x32xbf16>
    %c0_168 = arith.constant 0 : index
    %c0_169 = arith.constant 0 : index
    %c0_170 = arith.constant 0 : index
    %267 = vector.load %arg14[%c0_168, %c0_169, %c0_170] : memref<1x32x64xbf16, #tpu.memory_space<vmem>>, vector<1x32x64xbf16>
    %268 = vector.shape_cast %267 : vector<1x32x64xbf16> to vector<32x64xbf16>
    %cst_171 = arith.constant dense<0.000000e+00> : vector<16x64xf32>
    %269 = tpu.matmul %266, %268, %cst_171 {dimension_numbers = #tpu.dot_dimension_numbers<[1], [0], [0], [1], [0, 0, 1, 1], [], []>} : vector<16x32xbf16>, vector<32x64xbf16>, vector<16x64xf32> -> vector<16x64xf32>
    %c0_172 = arith.constant 0 : index
    %c0_173 = arith.constant 0 : index
    %c0_174 = arith.constant 0 : index
    %270 = vector.load %arg15[%c0_172, %c0_173, %c0_174] : memref<1x1x64xf32, #tpu.memory_space<vmem>>, vector<1x1x64xf32>
    %271 = vector.shape_cast %270 : vector<1x1x64xf32> to vector<1x64xf32>
    %272 = vector.broadcast %271 : vector<1x64xf32> to vector<16x64xf32>
    %273 = arith.addf %269, %272 : vector<16x64xf32>
    %cst_175 = arith.constant 5.000000e-01 : f32
    %274 = vector.broadcast %cst_175 : f32 to vector<16x64xf32>
    %275 = arith.mulf %274, %273 : vector<16x64xf32>
    %cst_176 = arith.constant 0.707106769 : f32
    %276 = vector.broadcast %cst_176 : f32 to vector<16x64xf32>
    %277 = arith.mulf %273, %276 : vector<16x64xf32>
    %cst_177 = arith.constant 0.000000e+00 : f32
    %278 = vector.broadcast %cst_177 : f32 to vector<16x64xf32>
    %279 = arith.cmpf oge, %277, %278 : vector<16x64xf32>
    %cst_178 = arith.constant 1.000000e+00 : f32
    %cst_179 = arith.constant -1.000000e+00 : f32
    %280 = vector.broadcast %cst_178 : f32 to vector<16x64xf32>
    %281 = vector.broadcast %cst_179 : f32 to vector<16x64xf32>
    %282 = arith.select %279, %280, %281 : vector<16x64xi1>, vector<16x64xf32>
    %283 = math.absf %277 : vector<16x64xf32>
    %cst_180 = arith.constant 0.327591091 : f32
    %284 = vector.broadcast %cst_180 : f32 to vector<16x64xf32>
    %285 = arith.mulf %284, %283 : vector<16x64xf32>
    %cst_181 = arith.constant 1.000000e+00 : f32
    %286 = vector.broadcast %cst_181 : f32 to vector<16x64xf32>
    %287 = arith.addf %286, %285 : vector<16x64xf32>
    %cst_182 = arith.constant 1.000000e+00 : f32
    %288 = vector.broadcast %cst_182 : f32 to vector<16x64xf32>
    %289 = arith.divf %288, %287 : vector<16x64xf32>
    %cst_183 = arith.constant 1.06140542 : f32
    %290 = vector.broadcast %cst_183 : f32 to vector<16x64xf32>
    %291 = arith.mulf %290, %289 : vector<16x64xf32>
    %cst_184 = arith.constant -1.45315206 : f32
    %292 = vector.broadcast %cst_184 : f32 to vector<16x64xf32>
    %293 = arith.addf %291, %292 : vector<16x64xf32>
    %294 = arith.mulf %293, %289 : vector<16x64xf32>
    %cst_185 = arith.constant 1.42141378 : f32
    %295 = vector.broadcast %cst_185 : f32 to vector<16x64xf32>
    %296 = arith.addf %294, %295 : vector<16x64xf32>
    %297 = arith.mulf %296, %289 : vector<16x64xf32>
    %cst_186 = arith.constant -0.284496725 : f32
    %298 = vector.broadcast %cst_186 : f32 to vector<16x64xf32>
    %299 = arith.addf %297, %298 : vector<16x64xf32>
    %300 = arith.mulf %299, %289 : vector<16x64xf32>
    %cst_187 = arith.constant 0.254829586 : f32
    %301 = vector.broadcast %cst_187 : f32 to vector<16x64xf32>
    %302 = arith.addf %300, %301 : vector<16x64xf32>
    %303 = arith.mulf %302, %289 : vector<16x64xf32>
    %cst_188 = arith.constant 0.000000e+00 : f32
    %304 = vector.broadcast %cst_188 : f32 to vector<16x64xf32>
    %305 = arith.subf %304, %283 : vector<16x64xf32>
    %306 = arith.mulf %305, %283 : vector<16x64xf32>
    %307 = math.exp %306 : vector<16x64xf32>
    %308 = arith.mulf %303, %307 : vector<16x64xf32>
    %cst_189 = arith.constant 1.000000e+00 : f32
    %309 = vector.broadcast %cst_189 : f32 to vector<16x64xf32>
    %310 = arith.subf %309, %308 : vector<16x64xf32>
    %311 = arith.mulf %282, %310 : vector<16x64xf32>
    %cst_190 = arith.constant 1.000000e+00 : f32
    %312 = vector.broadcast %cst_190 : f32 to vector<16x64xf32>
    %313 = arith.addf %312, %311 : vector<16x64xf32>
    %314 = arith.mulf %275, %313 : vector<16x64xf32>
    %315 = arith.truncf %314 : vector<16x64xf32> to vector<16x64xbf16>
    %c0_191 = arith.constant 0 : index
    %c0_192 = arith.constant 0 : index
    %c0_193 = arith.constant 0 : index
    %316 = vector.load %arg16[%c0_191, %c0_192, %c0_193] : memref<1x64x32xbf16, #tpu.memory_space<vmem>>, vector<1x64x32xbf16>
    %317 = vector.shape_cast %316 : vector<1x64x32xbf16> to vector<64x32xbf16>
    %cst_194 = arith.constant dense<0.000000e+00> : vector<16x32xf32>
    %318 = tpu.matmul %315, %317, %cst_194 {dimension_numbers = #tpu.dot_dimension_numbers<[1], [0], [0], [1], [0, 0, 1, 1], [], []>} : vector<16x64xbf16>, vector<64x32xbf16>, vector<16x32xf32> -> vector<16x32xf32>
    %c0_195 = arith.constant 0 : index
    %c0_196 = arith.constant 0 : index
    %c0_197 = arith.constant 0 : index
    %319 = vector.load %arg17[%c0_195, %c0_196, %c0_197] : memref<1x1x32xf32, #tpu.memory_space<vmem>>, vector<1x1x32xf32>
    %320 = vector.shape_cast %319 : vector<1x1x32xf32> to vector<1x32xf32>
    %321 = vector.broadcast %320 : vector<1x32xf32> to vector<16x32xf32>
    %322 = arith.addf %318, %321 : vector<16x32xf32>
    %323 = arith.addf %239, %322 : vector<16x32xf32>
    %c0_198 = arith.constant 0 : index
    %c0_199 = arith.constant 0 : index
    %324 = vector.load %arg25[%c0_198, %c0_199] : memref<16x32xf32, #tpu.memory_space<vmem>>, vector<16x32xf32>
    tpu.vector_store %arg25[%c0_198, %c0_199], %323 {strides = array<i32>} : memref<16x32xf32, #tpu.memory_space<vmem>>, vector<16x32xf32>,
    %c1_i32_200 = arith.constant 1 : i32
    %325 = arith.cmpi eq, %arg0, %c1_i32_200 : i32
    %326 = arith.extui %325 : i1 to i32
    %c0_i32_201 = arith.constant 0 : i32
    %327 = arith.cmpi ne, %326, %c0_i32_201 : i32
    scf.if %327 {
      %c0_202 = arith.constant 0 : index
      %c0_203 = arith.constant 0 : index
      %328 = vector.load %arg3[%c0_202, %c0_203] : memref<2x16xf32, #tpu.memory_space<vmem>>, vector<2x16xf32>
      %cst_204 = arith.constant dense<0.000000e+00> : vector<2x32xf32>
      %329 = tpu.matmul %328, %323, %cst_204 {dimension_numbers = #tpu.dot_dimension_numbers<[1], [0], [0], [1], [0, 0, 1, 1], [], []>} : vector<2x16xf32>, vector<16x32xf32>, vector<2x32xf32> -> vector<2x32xf32>
      %c0_205 = arith.constant 0 : index
      %c0_206 = arith.constant 0 : index
      %330 = vector.load %arg18[%c0_205, %c0_206] : memref<1x32xf32, #tpu.memory_space<vmem>>, vector<1x32xf32>
      %c0_207 = arith.constant 0 : index
      %c0_208 = arith.constant 0 : index
      %331 = vector.load %arg19[%c0_207, %c0_208] : memref<1x32xf32, #tpu.memory_space<vmem>>, vector<1x32xf32>
      %cst_209 = arith.constant dense<0.000000e+00> : vector<2xf32>
      %332 = vector.multi_reduction <add>, %329, %cst_209 [1] : vector<2x32xf32> to vector<2xf32>
      %333 = vector.shape_cast %332 : vector<2xf32> to vector<2x1xf32>
      %cst_210 = arith.constant 3.200000e+01 : f32
      %334 = vector.broadcast %cst_210 : f32 to vector<2x1xf32>
      %335 = arith.divf %333, %334 : vector<2x1xf32>
      %336 = vector.broadcast %335 : vector<2x1xf32> to vector<2x32xf32>
      %337 = arith.subf %329, %336 : vector<2x32xf32>
      %338 = arith.mulf %337, %337 : vector<2x32xf32>
      %cst_211 = arith.constant dense<0.000000e+00> : vector<2xf32>
      %339 = vector.multi_reduction <add>, %338, %cst_211 [1] : vector<2x32xf32> to vector<2xf32>
      %340 = vector.shape_cast %339 : vector<2xf32> to vector<2x1xf32>
      %cst_212 = arith.constant 3.200000e+01 : f32
      %341 = vector.broadcast %cst_212 : f32 to vector<2x1xf32>
      %342 = arith.divf %340, %341 : vector<2x1xf32>
      %343 = vector.broadcast %335 : vector<2x1xf32> to vector<2x32xf32>
      %344 = arith.subf %329, %343 : vector<2x32xf32>
      %cst_213 = arith.constant 9.99999974E-6 : f32
      %345 = vector.broadcast %cst_213 : f32 to vector<2x1xf32>
      %346 = arith.addf %342, %345 : vector<2x1xf32>
      %347 = math.rsqrt %346 : vector<2x1xf32>
      %348 = vector.broadcast %347 : vector<2x1xf32> to vector<2x32xf32>
      %349 = arith.mulf %344, %348 : vector<2x32xf32>
      %350 = vector.broadcast %330 : vector<1x32xf32> to vector<2x32xf32>
      %351 = arith.mulf %349, %350 : vector<2x32xf32>
      %352 = vector.broadcast %331 : vector<1x32xf32> to vector<2x32xf32>
      %353 = arith.addf %351, %352 : vector<2x32xf32>
      %354 = arith.truncf %353 : vector<2x32xf32> to vector<2x32xbf16>
      %c0_214 = arith.constant 0 : index
      %c0_215 = arith.constant 0 : index
      %355 = vector.load %arg20[%c0_214, %c0_215] : memref<32x512xbf16, #tpu.memory_space<vmem>>, vector<32x512xbf16>
      %cst_216 = arith.constant dense<0.000000e+00> : vector<2x512xf32>
      %356 = tpu.matmul %354, %355, %cst_216 {dimension_numbers = #tpu.dot_dimension_numbers<[1], [0], [0], [1], [0, 0, 1, 1], [], []>} : vector<2x32xbf16>, vector<32x512xbf16>, vector<2x512xf32> -> vector<2x512xf32>
      %c0_217 = arith.constant 0 : index
      %c0_218 = arith.constant 0 : index
      %357 = vector.load %arg21[%c0_217, %c0_218] : memref<1x512xf32, #tpu.memory_space<vmem>>, vector<1x512xf32>
      %358 = vector.broadcast %357 : vector<1x512xf32> to vector<2x512xf32>
      %359 = arith.addf %356, %358 : vector<2x512xf32>
      %cst_219 = arith.constant 0.000000e+00 : f32
      %360 = vector.broadcast %cst_219 : f32 to vector<2x512xf32>
      %361 = arith.maximumf %359, %360 : vector<2x512xf32>
      %362 = arith.truncf %361 : vector<2x512xf32> to vector<2x512xbf16>
      %c0_220 = arith.constant 0 : index
      %c0_221 = arith.constant 0 : index
      %363 = vector.load %arg22[%c0_220, %c0_221] : memref<512x128xbf16, #tpu.memory_space<vmem>>, vector<512x128xbf16>
      %cst_222 = arith.constant dense<0.000000e+00> : vector<2x128xf32>
      %364 = tpu.matmul %362, %363, %cst_222 {dimension_numbers = #tpu.dot_dimension_numbers<[1], [0], [0], [1], [0, 0, 1, 1], [], []>} : vector<2x512xbf16>, vector<512x128xbf16>, vector<2x128xf32> -> vector<2x128xf32>
      %c0_223 = arith.constant 0 : index
      %c0_224 = arith.constant 0 : index
      %365 = vector.load %arg23[%c0_223, %c0_224] : memref<1x128xf32, #tpu.memory_space<vmem>>, vector<1x128xf32>
      %366 = vector.broadcast %365 : vector<1x128xf32> to vector<2x128xf32>
      %367 = arith.addf %364, %366 : vector<2x128xf32>
      %c0_225 = arith.constant 0 : index
      %c0_226 = arith.constant 0 : index
      %368 = vector.load %arg24[%c0_225, %c0_226] : memref<2x128xf32, #tpu.memory_space<vmem>>, vector<2x128xf32>
      tpu.vector_store %arg24[%c0_225, %c0_226], %367 {strides = array<i32>} : memref<2x128xf32, #tpu.memory_space<vmem>>, vector<2x128xf32>,
    } else {
    }
    return
  }
  func.func @transform_0(%arg0: i32) -> (i32, i32) {
    %c0_i32 = arith.constant 0 : i32
    %c0_i32_0 = arith.constant 0 : i32
    %c0_i32_1 = arith.constant 0 : i32
    return %c0_i32, %c0_i32_0 : i32, i32
  }
  func.func @transform_1(%arg0: i32) -> (i32, i32) {
    %c0_i32 = arith.constant 0 : i32
    %c0_i32_0 = arith.constant 0 : i32
    %c0_i32_1 = arith.constant 0 : i32
    return %c0_i32, %c0_i32_0 : i32, i32
  }
  func.func @transform_2(%arg0: i32) -> (i32, i32) {
    %c0_i32 = arith.constant 0 : i32
    %c0_i32_0 = arith.constant 0 : i32
    %c0_i32_1 = arith.constant 0 : i32
    return %c0_i32, %c0_i32_0 : i32, i32
  }
  func.func @transform_3(%arg0: i32) -> (i32, i32) {
    %c0_i32 = arith.constant 0 : i32
    %c0_i32_0 = arith.constant 0 : i32
    %c0_i32_1 = arith.constant 0 : i32
    return %c0_i32, %c0_i32_0 : i32, i32
  }
  func.func @transform_4(%arg0: i32) -> (i32, i32) {
    %c0_i32 = arith.constant 0 : i32
    %c0_i32_0 = arith.constant 0 : i32
    %c0_i32_1 = arith.constant 0 : i32
    return %c0_i32, %c0_i32_0 : i32, i32
  }
  func.func @transform_5(%arg0: i32) -> (i32, i32, i32) {
    %c0_i32 = arith.constant 0 : i32
    %c0_i32_0 = arith.constant 0 : i32
    %c0_i32_1 = arith.constant 0 : i32
    return %arg0, %c0_i32, %c0_i32_0 : i32, i32, i32
  }
  func.func @transform_6(%arg0: i32) -> (i32, i32, i32) {
    %c0_i32 = arith.constant 0 : i32
    %c0_i32_0 = arith.constant 0 : i32
    %c0_i32_1 = arith.constant 0 : i32
    return %arg0, %c0_i32, %c0_i32_0 : i32, i32, i32
  }
  func.func @transform_7(%arg0: i32) -> (i32, i32, i32, i32) {
    %c0_i32 = arith.constant 0 : i32
    %c0_i32_0 = arith.constant 0 : i32
    %c0_i32_1 = arith.constant 0 : i32
    %c0_i32_2 = arith.constant 0 : i32
    return %arg0, %c0_i32, %c0_i32_0, %c0_i32_1 : i32, i32, i32, i32
  }
  func.func @transform_8(%arg0: i32) -> (i32, i32, i32, i32) {
    %c0_i32 = arith.constant 0 : i32
    %c0_i32_0 = arith.constant 0 : i32
    %c0_i32_1 = arith.constant 0 : i32
    %c0_i32_2 = arith.constant 0 : i32
    return %arg0, %c0_i32, %c0_i32_0, %c0_i32_1 : i32, i32, i32, i32
  }
  func.func @transform_9(%arg0: i32) -> (i32, i32, i32, i32) {
    %c0_i32 = arith.constant 0 : i32
    %c0_i32_0 = arith.constant 0 : i32
    %c0_i32_1 = arith.constant 0 : i32
    %c0_i32_2 = arith.constant 0 : i32
    return %arg0, %c0_i32, %c0_i32_0, %c0_i32_1 : i32, i32, i32, i32
  }
  func.func @transform_10(%arg0: i32) -> (i32, i32, i32) {
    %c0_i32 = arith.constant 0 : i32
    %c0_i32_0 = arith.constant 0 : i32
    %c0_i32_1 = arith.constant 0 : i32
    return %arg0, %c0_i32, %c0_i32_0 : i32, i32, i32
  }
  func.func @transform_11(%arg0: i32) -> (i32, i32, i32) {
    %c0_i32 = arith.constant 0 : i32
    %c0_i32_0 = arith.constant 0 : i32
    %c0_i32_1 = arith.constant 0 : i32
    return %arg0, %c0_i32, %c0_i32_0 : i32, i32, i32
  }
  func.func @transform_12(%arg0: i32) -> (i32, i32, i32) {
    %c0_i32 = arith.constant 0 : i32
    %c0_i32_0 = arith.constant 0 : i32
    %c0_i32_1 = arith.constant 0 : i32
    return %arg0, %c0_i32, %c0_i32_0 : i32, i32, i32
  }
  func.func @transform_13(%arg0: i32) -> (i32, i32, i32) {
    %c0_i32 = arith.constant 0 : i32
    %c0_i32_0 = arith.constant 0 : i32
    %c0_i32_1 = arith.constant 0 : i32
    return %arg0, %c0_i32, %c0_i32_0 : i32, i32, i32
  }
  func.func @transform_14(%arg0: i32) -> (i32, i32, i32) {
    %c0_i32 = arith.constant 0 : i32
    %c0_i32_0 = arith.constant 0 : i32
    %c0_i32_1 = arith.constant 0 : i32
    return %arg0, %c0_i32, %c0_i32_0 : i32, i32, i32
  }
  func.func @transform_15(%arg0: i32) -> (i32, i32, i32) {
    %c0_i32 = arith.constant 0 : i32
    %c0_i32_0 = arith.constant 0 : i32
    %c0_i32_1 = arith.constant 0 : i32
    return %arg0, %c0_i32, %c0_i32_0 : i32, i32, i32
  }
  func.func @transform_16(%arg0: i32) -> (i32, i32, i32) {
    %c0_i32 = arith.constant 0 : i32
    %c0_i32_0 = arith.constant 0 : i32
    %c0_i32_1 = arith.constant 0 : i32
    return %arg0, %c0_i32, %c0_i32_0 : i32, i32, i32
  }
  func.func @transform_17(%arg0: i32) -> (i32, i32) {
    %c0_i32 = arith.constant 0 : i32
    %c0_i32_0 = arith.constant 0 : i32
    %c0_i32_1 = arith.constant 0 : i32
    return %c0_i32, %c0_i32_0 : i32, i32
  }
  func.func @transform_18(%arg0: i32) -> (i32, i32) {
    %c0_i32 = arith.constant 0 : i32
    %c0_i32_0 = arith.constant 0 : i32
    %c0_i32_1 = arith.constant 0 : i32
    return %c0_i32, %c0_i32_0 : i32, i32
  }
  func.func @transform_19(%arg0: i32) -> (i32, i32) {
    %c0_i32 = arith.constant 0 : i32
    %c0_i32_0 = arith.constant 0 : i32
    %c0_i32_1 = arith.constant 0 : i32
    return %c0_i32, %c0_i32_0 : i32, i32
  }
  func.func @transform_20(%arg0: i32) -> (i32, i32) {
    %c0_i32 = arith.constant 0 : i32
    %c0_i32_0 = arith.constant 0 : i32
    %c0_i32_1 = arith.constant 0 : i32
    return %c0_i32, %c0_i32_0 : i32, i32
  }
  func.func @transform_21(%arg0: i32) -> (i32, i32) {
    %c0_i32 = arith.constant 0 : i32
    %c0_i32_0 = arith.constant 0 : i32
    %c0_i32_1 = arith.constant 0 : i32
    return %c0_i32, %c0_i32_0 : i32, i32
  }
  func.func @transform_22(%arg0: i32) -> (i32, i32) {
    %c0_i32 = arith.constant 0 : i32
    %c0_i32_0 = arith.constant 0 : i32
    %c0_i32_1 = arith.constant 0 : i32
    return %c0_i32, %c0_i32_0 : i32, i32
  }
  func.func @transform_23(%arg0: i32) -> (i32, i32) {
    %c0_i32 = arith.constant 0 : i32
    %c0_i32_0 = arith.constant 0 : i32
    %c0_i32_1 = arith.constant 0 : i32
    return %c0_i32, %c0_i32_0 : i32, i32
  }
}

</mosaic_0001>

<bundles_post_ra>
// kernel: tpu_custom_call.1
= control target key start
LH: loop header
LB: loop body
LE: loop exit
PB: predicated region body
PF: predicated region fallthrough
CT: control target
= control target key end

     0   :  { %s5561_s0 = inlined_call_operand.vmem [shape: s32[2,8], index: 0, kind: input, shape index: {}]   ;;  %s5562_s1 = inlined_call_operand.vmem [shape: s32[16,1], index: 1, kind: input, shape index: {}]   ;;  %s5563_s2 = inlined_call_operand.vmem [shape: f32[2,16], index: 2, kind: input, shape index: {}]   ;;  %s5564_s3 = inlined_call_operand.vmem [shape: f32[33,32], index: 3, kind: input, shape index: {}]   ;;  %s5565_s4 = inlined_call_operand.vmem [shape: f32[64,32], index: 4, kind: input, shape index: {}]   ;;  %s5566_s5 = inlined_call_operand.vmem [shape: f32[2,1,32], index: 5, kind: input, shape index: {}]   ;;  %s5567_s6 = inlined_call_operand.vmem [shape: f32[2,1,32], index: 6, kind: input, shape index: {}]   ;;  %s5568_s7 = inlined_call_operand.vmem [shape: bf16[2,12,32,8], index: 7, kind: input, shape index: {}]   ;;  %s5569_s8 = inlined_call_operand.vmem [shape: f32[2,12,1,8], index: 8, kind: input, shape index: {}]   ;;  %s5570_s9 = inlined_call_operand.vmem [shape: bf16[2,4,8,32], index: 9, kind: input, shape index: {}]   ;;  %s5571_s10 = inlined_call_operand.vmem [shape: f32[2,1,32], index: 10, kind: input, shape index: {}]   ;;  %s5572_s11 = inlined_call_operand.vmem [shape: f32[2,1,32], index: 11, kind: input, shape index: {}]   ;;  %s5573_s12 = inlined_call_operand.vmem [shape: f32[2,1,32], index: 12, kind: input, shape index: {}]   ;;  %s5574_s13 = inlined_call_operand.vmem [shape: bf16[2,32,64], index: 13, kind: input, shape index: {}]   ;;  %s5575_s14 = inlined_call_operand.vmem [shape: f32[2,1,64], index: 14, kind: input, shape index: {}]   ;;  %s5576_s15 = inlined_call_operand.vmem [shape: bf16[2,64,32], index: 15, kind: input, shape index: {}]   ;;  %s5577_s16 = inlined_call_operand.vmem [shape: f32[2,1,32], index: 16, kind: input, shape index: {}]   ;;  %s5578_s17 = inlined_call_operand.vmem [shape: f32[1,32], index: 17, kind: input, shape index: {}]   ;;  %s5579_s18 = inlined_call_operand.vmem [shape: f32[1,32], index: 18, kind: input, shape index: {}]   ;;  %s5580_s19 = inlined_call_operand.vmem [shape: bf16[32,512], index: 19, kind: input, shape index: {}]   ;;  %s5581_s20 = inlined_call_operand.vmem [shape: f32[1,512], index: 20, kind: input, shape index: {}]   ;;  %s5582_s21 = inlined_call_operand.vmem [shape: bf16[512,128], index: 21, kind: input, shape index: {}]   ;;  %s5583_s22 = inlined_call_operand.vmem [shape: f32[1,128], index: 22, kind: input, shape index: {}]   ;;  %s5584_s23 = inlined_call_operand.hbm [shape: f32[2,128], index: 23, kind: output, shape index: {}]  }
   0x1   :  { %5590 = sst [smem:[#allocation7_spill]] %s5561_s0 }
   0x2   :  { %5591 = sst [smem:[#allocation8_spill]] %s5562_s1 }
   0x3   :  { %5592 = sst [smem:[#allocation9_spill]] %s5563_s2 }
   0x4   :  { %5593 = sst [smem:[#allocation10_spill]] %s5564_s3 }
   0x5   :  { %5594 = sst [smem:[#allocation11_spill]] %s5565_s4 }
   0x6   :  { %5595 = sst [smem:[#allocation12_spill]] %s5566_s5 }
   0x7   :  { %5596 = sst [smem:[#allocation13_spill]] %s5567_s6 }
   0x8   :  { %5597 = sst [smem:[#allocation14_spill]] %s5568_s7 }
   0x9   :  { %5598 = sst [smem:[#allocation15_spill]] %s5570_s9 }
   0xa   :  { %5599 = sst [smem:[#allocation16_spill]] %s5578_s17 }
   0xb   :  { %5600 = sst [smem:[#allocation17_spill]] %s5579_s18 }
   0xc   :  { %5601 = sst [smem:[#allocation18_spill]] %s5581_s20 }
   0xd   :  { %5602 = sst [smem:[#allocation19_spill]] %s5582_s21 }
   0xe   :  { %5603 = sst [smem:[#allocation20_spill]] %s5583_s22 }
   0xf   :  { %5604 = sst [smem:[#allocation21_spill]] %s5584_s23 }
  0x10   :  { %28 = vsyncpa [#allocation4], 0  ;;  %s4950_s4 = smov 0  }
  0x11 LB: > { %5605 = sst [smem:[#allocation6_spill]] %s4817_s4  ;;  %s4956_s30 = sadd.s32 4294967295, %s4817_s4   ;;  %s4817_s4 = sphi %s4950_s4, %s34_s4  }
  0x12   : > { %p4010_p0 = scmp.ge.s32.totalorder %s4817_s4, 1  ;;  %p728_p1 = scmp.lt.s32.totalorder %s4817_s4, 3 }
  0x14   : > { %p729_p2 = pnand %p4010_p0, %p728_p1 }
  0x15   : > { %p827_p3 = scmp.lt.s32.totalorder (!%p729_p2), %s4956_s30, 1  ;;  %s5608_s9 = sld [smem:[#allocation15_spill]] (!%p729_p2) }
  0x16   : > { %732 = sbr.rel (%p729_p2) target bundleno = 6428 (0x191c), region = 112  ;;  %s5609_s22 = sld [smem:[#allocation14_spill]] (!%p729_p2) }
  0x17   : > { %p4018_p4 = scmp.ne.s32.totalorder (!%p729_p2), %s4956_s30, 0 }
  0x1d   : > { %s4962_s24 = scalar_select %p827_p3, %s4956_s30, 1 }
  0x1e   : > { %s5610_s23 = sld [smem:[#allocation8_spill]] (!%p4018_p4)  ;;  %s5611_s18 = sld [smem:[#allocation10_spill]] (!%p4018_p4)  ;;  %v4819_v2 = vmov (!%p4018_p4), 0   ;;  %vm905_vm2 = vcmask (!%p4018_p4), 1040384   ;;  %v4820_v10 = vmov (!%p4018_p4), 0.0   ;;  %v877_v15 = vlaneseq (!%p4018_p4) }
  0x1f   : > { %s4626_s28 = smul.u32 192, %s4962_s24  ;;  %s4218_s29 = sshll.u32 %s4962_s24, 4  ;;  %4653 = vset.pattern.permute.xlu0 (!%p4018_p4), %v4819_v2  ;;  %4654 = vset.pattern.permute.xlu1 (!%p4018_p4), %v4819_v2  ;;  %vm898_vm3 = vcmask (!%p4018_p4), 269312   ;;  %vm1009_vm6 = vcmask (!%p4018_p4), 261120  }
  0x20   : > { %s4627_s3 = smul.u32 12, %s4962_s24  ;;  %s4978_s5 = scalar_lea.vmem %s5608_s9, %s4218_s29  ;;  %v878_v16 = vand.u32 (!%p4018_p4), 127, %v877_v15 }
  0x21   : > { %s4983_s20 = scalar_lea.vmem %s5609_s22, %s4626_s28  ;;  %s852_s0 = scalar_lea.vmem %s5572_s11, %s4962_s24 }
  0x22   : > { %s4992_s6 = scalar_lea.vmem %s5569_s8, %s4627_s3  ;;  %s855_s21 = scalar_lea.vmem %s5573_s12, %s4962_s24 }
  0x23   : > { %s5005_s4 = scalar_lea.vmem %s5574_s13, %s4218_s29  ;;  %s863_s28 = scalar_lea.vmem %s5575_s14, %s4962_s24 }
  0x24   : > { %s4220_s26 = sshll.u32 %s4962_s24, 5  ;;  %876 = sbr.rel (%p4018_p4) target bundleno = 391 (0x187), region = 116  ;;  %v879_v0 = vld [vmem:[%s5610_s23] sm:$0xff] (!%p4018_p4)  ;;  %v894_v3 = vld [vmem:[%s5611_s18 + $0x8] sm:$0xff] (!%p4018_p4)  ;;  %v895_v4 = vld [vmem:[%s5611_s18 + $0x10] sm:$0xff] (!%p4018_p4) }
  0x25   : > { %s5015_s1 = scalar_lea.vmem %s5576_s15, %s4220_s26  ;;  %v893_v1 = vld [vmem:[%s5611_s18] sm:$0xff] (!%p4018_p4)  ;;  %v896_v5 = vld [vmem:[%s5611_s18 + $0x18] sm:$0xff] (!%p4018_p4)  ;;  %882 = vperm.xlu0 (!%p4018_p4), %4653, %v879_v0   ;;  %v880_v8 = vld [vmem:[%s5610_s23 + $0x8] sm:$0xff] (!%p4018_p4)  ;;  %vm989_vm0 = vcmp.eq.s32.totalorder (!%p4018_p4), %v879_v0, 1  ;;  %s5612_s26 = sld [smem:[#allocation11_spill]] (!%p4018_p4) }
  0x26   : > { %v4615_v6 = vpack.c.bf16 (!%p4018_p4), %v894_v3, %v893_v1  ;;  %v4619_v7 = vpack.c.bf16 (!%p4018_p4), %v896_v5, %v895_v4  ;;  %vm990_vm1 = vcmp.eq.s32.totalorder (!%p4018_p4), %v880_v8, 1  ;;  %v897_v9 = vld [vmem:[%s5611_s18 + $0x20] sm:$0x1] (!%p4018_p4)  ;;  %v4024_v12 = vsel (!%p4018_p4), %vm989_vm0, 1.0, %v4820_v10 }
  0x27   : > { %v4025_v11 = vsel (!%p4018_p4), %vm990_vm1, 1.0, %v4820_v10  ;;  %v995_v13 = vsub.f32 (!%p4018_p4), 1.0, %v4024_v12 }
  0x28   : > { %4616 = vmatprep.subr.bf16.mxu0 (!%p4018_p4), %v4615_v6  ;;  %v996_v14 = vsub.f32 (!%p4018_p4), 1.0, %v4025_v11 }
  0x29   : > { %4618 = vmatpush3.bf16.msra.mxu0 (!%p4018_p4), %v4615_v6  ;;  %885 = vperm.xlu0 (!%p4018_p4), %4653, %v880_v8  }
  0x2a   : > { %4620 = vmatprep.subr.bf16.mxu0 (!%p4018_p4), %v4619_v7  ;;  %999 = vperm.xlu1 (!%p4018_p4), %4654, %v995_v13  }
  0x2b   : > { %v986_v23 = vld [vmem:[%s5612_s26] sm:$0xff] }
  0x2d   : > { %4622 = vmatpush3.bf16.msra.mxu0 %v4619_v7 }
  0x2e   : > { %4367 = vmatprep.subr.msk.mxu0 %vm905_vm2, %v897_v9  ;;  %1004 = vperm.xlu1 %4654, %v996_v14  }
  0x31   : > { %4368 = vmatpush3.msk.msra.mxu0 %vm905_vm2, %v897_v9 }
  0xa4   : > { %v883_v17 = vpop.permute.xlu0 %882 }
  0xa5   : > { %vm887_vm4 = vcmp.eq.s32.totalorder %v878_v16, %v883_v17 }
  0xa6   : > { %v4019_v18 = vsel %vm887_vm4, 1.0, %v4820_v10 }
  0xa7   : > { %4369 = vmatprep.mubr.msk.f32.mxu0 %vm898_vm3, %v4019_v18 }
  0xa8   : > { %v886_v19 = vpop.permute.xlu0 %885 }
  0xa9   : > { %vm888_vm5 = vcmp.eq.s32.totalorder %v878_v16, %v886_v19  ;;  %v1000_v21 = vpop.permute.xlu1 %999 }
  0xaa   : > { %v4020_v20 = vsel %vm888_vm5, 1.0, %v4820_v10 }
  0xab   : > { %4370 = vmatmul.mubr.msk.f32.vlgmr.msra.gmra.mrb[0].mxu0 %vm898_vm3, %v4020_v20 }
  0xad   : > { %v1005_v28 = vpop.permute.xlu1 %1004 }
 0x17e   : > { %v4371_v22 = vpop.f32.mrb[0].mxu0 }
 0x17f   : > { %v985_v24 = vmul.f32 5.656854, %v4371_v22  ;;  %v975_v25 = vpop.f32.mrb[1].mxu0 }
 0x180   : > { %v984_v26 = vmul.f32 5.656854, %v975_v25 }
 0x181   : > { %v988_v27 = vadd.f32 %v986_v23, %v985_v24 }
 0x182   : > { %v987_v29 = vadd.f32 %v986_v23, %v984_v26 }
 0x183   : > { %v1008_v30 = vmul.f32 %v1005_v28, %v988_v27 }
 0x184   : > { %v1007_v31 = vmul.f32 %v1000_v21, %v987_v29 }
 0x185   : > { %1011 = vst.msk [vmem:[#allocation2 + $0x8] sm:$0xff] %vm1009_vm6, %v1008_v30 }
 0x186   : > { %1010 = vst.msk [vmem:[#allocation2] sm:$0xff] %vm1009_vm6, %v1007_v31 }
 0x187 PF: > { %vm1042_vm7 = vcmask 261120   ;;  %v4655_v46 = vld [vmem:[%s4983_s20] sm:$0xff]   ;;  %v4821_v48 = vmov 0.0   ;;  %v4657_v49 = vld [vmem:[%s4983_s20 + $0x8] sm:$0xff]   ;;  %vm4822_vm8 = vmmov 0   ;;  %s5613_s27 = sld [smem:[#allocation12_spill]]  ;;  %s5619_s29 = scalar_lea.vmem %s5577_s16, %s4962_s24 }
 0x188   : > { %v4656_v47 = vld [vmem:[%s4983_s20 + $0x40] sm:$0xff]   ;;  %4372 = vmatprep.subr.bf16.mxu0 %v4821_v48  ;;  %4380 = vmatprep.subr.bf16.mxu1 %v4821_v48  ;;  %v4658_v50 = vld [vmem:[%s4983_s20 + $0x48] sm:$0xff]   ;;  %s5615_s17 = sld [smem:[#allocation13_spill]]  ;;  %vm1292_vm9 = vcmask 64512   ;;  %vm1426_vm10 = vcmask 1043456   ;;  %s5617_s2 = sld [smem:[#allocation7_spill]] }
 0x189   : > { %4373 = vmatpush3.bf16.msra.mxu0 %v4655_v46  ;;  %4381 = vmatpush3.bf16.msra.mxu1 %v4656_v47  ;;  %v4659_v3 = vld [vmem:[%s4983_s20 + $0x80] sm:$0xff]   ;;  %v4660_v5 = vld [vmem:[%s4983_s20 + $0x88] sm:$0xff]   ;;  %vm3184_vm14 = vcmask 523264   ;;  %p4167_p5 = scmp.ne.s32.totalorder %s4956_s30, 1 }
 0x18a   : > { %4374 = vmatprep.subr.bf16.mxu0 %v4821_v48  ;;  %4382 = vmatprep.subr.bf16.mxu1 %v4821_v48  ;;  %v4037_v6 = vld [vmem:[%s4992_s6 + $0x4] ss:$0 sm:$0xff]  ;;  %v4028_v18 = vld [vmem:[%s4992_s6] ss:$0 sm:$0xff]  ;;  %v4046_v21 = vld [vmem:[%s4992_s6 + $0x8] ss:$0 sm:$0xff] }
 0x18b   : > { %4376 = vmatprep.mubr.msk.bf16.mxu0 %vm4822_vm8, %v4821_v48  ;;  %4384 = vmatprep.mubr.msk.bf16.mxu1 %vm4822_vm8, %v4821_v48  ;;  %vm4826_vm15 = vmmov (!%p4167_p5), 0   ;;  %vm3238_vm0 = vcmask (!%p4167_p5), 130048   ;;  %vm3314_vm1 = vcmask (!%p4167_p5), 254976   ;;  %s5623_s7 = sld [smem:[#allocation17_spill]] (!%p4167_p5)  ;;  %s5625_s3 = sld [smem:[#allocation20_spill]] (!%p4167_p5) }
 0x18c   : > { %v1039_v33 = vld [vmem:[#allocation2 + $0x8] sm:$0xff] }
 0x18d   : > { %v1038_v32 = vld [vmem:[#allocation2] sm:$0xff]  ;;  %v1046_v35 = vsel %vm1042_vm7, %v1039_v33, 0.0  ;;  %4375 = vmatpush3.bf16.msra.mxu0 %v4657_v49  ;;  %4383 = vmatpush3.bf16.msra.mxu1 %v4658_v50  ;;  %s5614_s25 = scalar_lea.vmem %s5613_s27, %s4962_s24 }
 0x18e   : > { %v1043_v34 = vsel %vm1042_vm7, %v1038_v32, 0.0  ;;  %4388 = vmatprep.subr.bf16.mxu0 %v4821_v48  ;;  %4396 = vmatprep.subr.bf16.mxu1 %v4821_v48  ;;  %v4026_v59 = vld [vmem:[%s5614_s25] ss:$0 sm:$0xff]  ;;  %s5616_s9 = scalar_lea.vmem %s5615_s17, %s4962_s24  ;;  %s5620_s17 = sld [smem:[#allocation9_spill]] (!%p4167_p5) }
 0x18f   : > { %1044 = vadd.xlane.f32.xlu0 %v1043_v34  ;;  %v4027_v63 = vld [vmem:[%s5616_s9] ss:$0 sm:$0xff] }
 0x193   : > { %1047 = vadd.xlane.f32.xlu0 %v1046_v35 }
 0x21c   : > { %v1045_v36 = vpop.xlane.xlu0 %1044 }
 0x21d   : > { %v1050_v37 = vmul.f32 0.03125, %v1045_v36 }
 0x21f   : > { %v1052_v38 = vsub.f32 %v1038_v32, %v1050_v37  ;;  %v4823_v37 = vmov 1966171168  }
 0x220   : > { %v1048_v39 = vpop.xlane.xlu0 %1047 }
 0x221   : > { %v1051_v40 = vmul.f32 0.03125, %v1048_v39  ;;  %v1054_v41 = vmul.f32 %v1052_v38, %v1052_v38  ;;  %v1019_v39 = vlaneseq }
 0x223   : > { %v1053_v42 = vsub.f32 %v1039_v33, %v1051_v40  ;;  %v1056_v43 = vsel %vm1042_vm7, %v1054_v41, 0.0  ;;  %v1012_v40 = vld [vmem:[%s5617_s2] sm:$0x3] }
 0x224   : > { %1057 = vadd.xlane.f32.xlu1 %v1056_v43  ;;  %vm1013_vm11 = vcmp.eq.s32.totalorder %v1012_v40, 1 }
 0x225   : > { %v1055_v44 = vmul.f32 %v1053_v42, %v1053_v42 }
 0x227   : > { %v1059_v45 = vsel %vm1042_vm7, %v1055_v44, 0.0  ;;  %v1014_v44 = vsel %vm1013_vm11, -1e+09, %v4821_v48 }
 0x228   : > { %1060 = vadd.xlane.f32.xlu1 %v1059_v45 }
 0x2b1   : > { %v1058_v51 = vpop.xlane.xlu1 %1057 }
 0x2b2   : > { %v1062_v52 = vmul.f32 0.03125, %v1058_v51 }
 0x2b4   : > { %v1064_v53 = vadd.f32 1e-05, %v1062_v52 }
 0x2b5   : > { %v1061_v54 = vpop.xlane.xlu1 %1060 }
 0x2b6   : > { %4685 = vrsqrt.f32 %v1064_v53  ;;  %v1063_v55 = vmul.f32 0.03125, %v1061_v54 }
 0x2b8   : > { %v1065_v56 = vadd.f32 1e-05, %v1063_v55 }
 0x2ba   : > { %4687 = vrsqrt.f32 %v1065_v56 }
 0x2c0   : > { %v4686_v57 = vpop.eup %4685 }
 0x2c1   : > { %v1068_v58 = vmul.f32 %v4686_v57, %v1052_v38  ;;  %v1017_v38 = vunpack.c.l.s4 %v4823_v37 }
 0x2c3   : > { %v1076_v61 = vmul.f32 %v4026_v59, %v1068_v58  ;;  %v1018_v41 = vunpack.c.0.s8 %v1017_v38  ;;  %v4068_v38 = vld [vmem:[%s4992_s6 + $0x5] ss:$0 sm:$0xff] }
 0x2c4   : > { %v4688_v60 = vpop.eup %4687 }
 0x2c5   : > { %v1069_v62 = vmul.f32 %v4688_v60, %v1053_v42  ;;  %v1084_v1 = vadd.f32 %v4027_v63, %v1076_v61  ;;  %v5112_v42 = vshrl.u32 %v1019_v39, 7 }
 0x2c7   : > { %v1077_v0 = vmul.f32 %v4026_v59, %v1069_v62  ;;  %v1021_v43 = vsub.s32 %v1018_v41, %v5112_v42  ;;  %v5117_v49 = vsub.s32 0, %v5112_v42 }
 0x2c9   : > { %v1085_v2 = vadd.f32 %v4027_v63, %v1077_v0  ;;  %v1022_v45 = vrot.slane %v1014_v44, %v1021_v43 }
 0x2cb   : > { %v5075_v4 = vpack.c.bf16 %v1085_v2, %v1084_v1  ;;  %v1023_v46 = vcombine.high %v1022_v45, %v1022_v45  ;;  %v1030_v47 = vrot.slane %v1022_v45, %v1021_v43 }
 0x2cd   : > { %4377 = vmatmul.mubr.msk.bf16.vlgmr.msra.gmra.mrb[0].mxu0 %vm1042_vm7, %v5075_v4  ;;  %4385 = vmatmul.mubr.msk.bf16.vlgmr.msra.gmra.mrb[0].mxu1 %vm1042_vm7, %v5075_v4  ;;  %v1037_v50 = vrot.slane %v1023_v46, %v1021_v43  ;;  %v5120_v51 = vrot.slane %v1030_v47, %v5117_v49 }
 0x2ce   : > { %4389 = vmatpush3.bf16.msra.mxu0 %v4659_v3  ;;  %4392 = vmatprep.mubr.msk.bf16.mxu0 %vm4822_vm8, %v4821_v48 }
 0x2cf   : > { %4390 = vmatprep.subr.bf16.mxu0 %v4821_v48  ;;  %4398 = vmatprep.mubr.msk.bf16.mxu1 %vm4822_vm8, %v4821_v48  ;;  %v5123_v55 = vrot.slane %v1037_v50, %v5117_v49 }
 0x2d2   : > { %4391 = vmatpush3.bf16.msra.mxu0 %v4660_v5 }
 0x2d3   : > { %4402 = vmatprep.subr.bf16.mxu0 %v4821_v48 }
 0x2d5   : > { %4393 = vmatmul.mubr.msk.bf16.vlgmr.msra.gmra.mrb[4].mxu0 %vm1042_vm7, %v5075_v4 }
 0x2d6   : > { %4404 = vmatprep.mubr.msk.bf16.mxu0 %vm4822_vm8, %v4821_v48 }
 0x3a0   : > { %v1147_v7 = vpop.f32.mrb[0].mxu0  ;;  %v1213_v8 = vpop.f32.mrb[0].mxu1 }
 0x3a1   : > { %v1214_v9 = vadd.f32 %v4037_v6, %v1213_v8  ;;  %v4378_v10 = vpop.f32.mrb[1].mxu0  ;;  %v4386_v11 = vpop.f32.mrb[1].mxu1  ;;  %v1148_v22 = vadd.f32 %v4028_v18, %v1147_v7 }
 0x3a2   : > { %v1150_v12 = vpop.f32.mrb[2].mxu0  ;;  %v1216_v13 = vpop.f32.mrb[2].mxu1 }
 0x3a3   : > { %v1288_v14 = vpack.c.bf16 %v1214_v9, %v1214_v9  ;;  %v1217_v15 = vadd.f32 %v4037_v6, %v1216_v13  ;;  %v4379_v16 = vpop.f32.mrb[3].mxu0  ;;  %v4387_v17 = vpop.f32.mrb[3].mxu1  ;;  %v1151_v25 = vadd.f32 %v4028_v18, %v1150_v12  ;;  %v1286_v29 = vpack.c.bf16 %v1148_v22, %v1148_v22  ;;  %v4662_v22 = vld [vmem:[%s4983_s20 + $0x50] sm:$0xff]  }
 0x3a5   : > { %v1297_v19 = vsel %vm1292_vm9, %v1288_v14, 0  ;;  %v1289_v20 = vpack.c.bf16 %v1217_v15, %v1217_v15  ;;  %v1287_v33 = vpack.c.bf16 %v1151_v25, %v1151_v25  ;;  %v4664_v25 = vld [vmem:[%s4983_s20 + $0x58] sm:$0xff]  }
 0x3a6   : > { %4397 = vmatpush3.bf16.xpose.msra.mxu1 %v1297_v19  ;;  %v4661_v19 = vld [vmem:[%s4983_s20 + $0x10] sm:$0xff]  }
 0x3a7   : > { %v1343_v23 = vsel %vm1292_vm9, %v1289_v20, 0  ;;  %4408 = vmatprep.subr.bf16.mxu1 %v4821_v48 }
 0x3a8   : > { %v1279_v24 = vpop.f32.mrb[4].mxu0  ;;  %4403 = vmatpush3.bf16.xpose.msra.mxu0 %v1343_v23 }
 0x3a9   : > { %v1280_v26 = vadd.f32 %v4046_v21, %v1279_v24  ;;  %v4394_v27 = vpop.f32.mrb[5].mxu0  ;;  %4414 = vmatprep.subr.bf16.mxu0 %v4821_v48  ;;  %v4663_v24 = vld [vmem:[%s4983_s20 + $0x18] sm:$0xff]  }
 0x3aa   : > { %v1282_v28 = vpop.f32.mrb[6].mxu0  ;;  %v4666_v27 = vld [vmem:[%s4983_s20 + $0x98] sm:$0xff]  }
 0x3ab   : > { %v1290_v30 = vpack.c.bf16 %v1280_v26, %v1280_v26  ;;  %v1283_v31 = vadd.f32 %v4046_v21, %v1282_v28  ;;  %v4395_v32 = vpop.f32.mrb[7].mxu0  ;;  %v4665_v26 = vld [vmem:[%s4983_s20 + $0x90] sm:$0xff]  }
 0x3ad   : > { %v1428_v34 = vsel %vm1426_vm10, %v1290_v30, 0  ;;  %v1291_v35 = vpack.c.bf16 %v1283_v31, %v1283_v31  ;;  %4399 = vmatmul.mubr.msk.bf16.vlgmr.msra.gmra.mrb[4].mxu1 %vm1292_vm9, %v1286_v29 }
 0x3ae   : > { %4409 = vmatpush3.bf16.msra.mxu1 %v1428_v34  ;;  %4410 = vmatprep.mubr.msk.bf16.mxu1 %vm4822_vm8, %v4821_v48 }
 0x3af   : > { %v1474_v36 = vsel %vm1426_vm10, %v1291_v35, 0  ;;  %4405 = vmatmul.mubr.msk.bf16.vlgmr.msra.gmra.mrb[8].mxu0 %vm1292_vm9, %v1287_v33  ;;  %4420 = vmatprep.subr.bf16.mxu1 %v4821_v48 }
 0x3b0   : > { %4415 = vmatpush3.bf16.msra.mxu0 %v1474_v36  ;;  %4416 = vmatprep.mubr.msk.bf16.mxu0 %vm4822_vm8, %v4821_v48 }
 0x3b1   : > { %4428 = vmatprep.subr.bf16.mxu0 %v4821_v48 }
 0x480   : > { %v1333_v52 = vpop.f32.mrb[4].mxu1 }
 0x481   : > { %v1385_v53 = vmul.f32 0.35355338, %v1333_v52  ;;  %v4400_v54 = vpop.f32.mrb[5].mxu1 }
 0x482   : > { %v1336_v56 = vpop.f32.mrb[6].mxu1  ;;  %v1379_v57 = vpop.f32.mrb[8].mxu0  ;;  %v4077_v54 = vld [vmem:[%s4992_s6 + $0x9] ss:$0 sm:$0xff] }
 0x483   : > { %v1386_v58 = vmul.f32 0.35355338, %v1379_v57  ;;  %v4401_v59 = vpop.f32.mrb[7].mxu1  ;;  %v4406_v60 = vpop.f32.mrb[9].mxu0  ;;  %v1397_v61 = vadd.f32 %v5120_v51, %v1385_v53  ;;  %v4059_v53 = vld [vmem:[%s4992_s6 + $0x1] ss:$0 sm:$0xff] }
 0x484   : > { %v1382_v62 = vpop.f32.mrb[10].mxu0 }
 0x485   : > { %v4407_v63 = vpop.f32.mrb[11].mxu0  ;;  %v1399_v0 = vsel %vm1292_vm9, %v1397_v61, -inf  ;;  %v1398_v1 = vadd.f32 %v5123_v55, %v1386_v58 }
 0x486   : > { %1400 = vmax.xlane.f32.xlu1 %v1399_v0 }
 0x487   : > { %v1402_v2 = vsel %vm1292_vm9, %v1398_v1, -inf }
 0x488   : > { %1403 = vmax.xlane.f32.xlu0 %v1402_v2 }
 0x513   : > { %v1401_v3 = vpop.xlane.xlu1 %1400 }
 0x514   : > { %v1405_v5 = vsub.f32 %v1397_v61, %v1401_v3 }
 0x515   : > { %v1404_v6 = vpop.xlane.xlu0 %1403 }
 0x516   : > { %v1407_v7 = vmul.f32 1.442695, %v1405_v5  ;;  %v1406_v8 = vsub.f32 %v1398_v1, %v1404_v6 }
 0x518   : > { %4689 = vpow2.f32 %v1407_v7  ;;  %v1409_v9 = vmul.f32 1.442695, %v1406_v8 }
 0x51a   : > { %4691 = vpow2.f32 %v1409_v9 }
 0x522   : > { %v4690_v10 = vpop.eup %4689 }
 0x523   : > { %v1411_v11 = vsel %vm1292_vm9, %v4690_v10, 0.0 }
 0x524   : > { %v4692_v12 = vpop.eup %4691  ;;  %1412 = vadd.xlane.f32.xlu1 %v1411_v11 }
 0x525   : > { %v1414_v13 = vsel %vm1292_vm9, %v4692_v12, 0.0 }
 0x526   : > { %1415 = vadd.xlane.f32.xlu0 %v1414_v13 }
 0x5b1   : > { %v1413_v14 = vpop.xlane.xlu1 %1412 }
 0x5b2   : > { %4693 = vrcp.f32 %v1413_v14 }
 0x5b3   : > { %v1416_v15 = vpop.xlane.xlu0 %1415 }
 0x5b4   : > { %4695 = vrcp.f32 %v1416_v15 }
 0x5bc   : > { %v4694_v16 = vpop.eup %4693 }
 0x5bd   : > { %v1418_v17 = vmul.f32 %v4694_v16, %v4690_v10 }
 0x5be   : > { %v4696_v18 = vpop.eup %4695 }
 0x5bf   : > { %v1420_v20 = vmul.f32 %v4696_v18, %v4692_v12  ;;  %v1421_v21 = vpack.c.bf16 %v1418_v17, %v1418_v17 }
 0x5c1   : > { %4411 = vmatmul.mubr.msk.bf16.vlgmr.msra.gmra.mrb[8].mxu1 %vm1292_vm9, %v1421_v21  ;;  %v1422_v23 = vpack.c.bf16 %v1420_v20, %v1420_v20 }
 0x5c2   : > { %4421 = vmatpush3.bf16.msra.mxu1 %v4661_v19  ;;  %4424 = vmatprep.mubr.msk.bf16.mxu1 %vm4822_vm8, %v4821_v48 }
 0x5c3   : > { %4417 = vmatmul.mubr.msk.bf16.vlgmr.msra.gmra.mrb[12].mxu0 %vm1292_vm9, %v1422_v23  ;;  %4422 = vmatprep.subr.bf16.mxu1 %v4821_v48 }
 0x5c4   : > { %4429 = vmatpush3.bf16.msra.mxu0 %v4662_v22  ;;  %4432 = vmatprep.mubr.msk.bf16.mxu0 %vm4822_vm8, %v4821_v48 }
 0x5c5   : > { %4430 = vmatprep.subr.bf16.mxu0 %v4821_v48 }
 0x5c6   : > { %4423 = vmatpush3.bf16.msra.mxu1 %v4663_v24 }
 0x5c7   : > { %4436 = vmatprep.subr.bf16.mxu1 %v4821_v48 }
 0x5c8   : > { %4431 = vmatpush3.bf16.msra.mxu0 %v4664_v25 }
 0x5c9   : > { %4425 = vmatmul.mubr.msk.bf16.vlgmr.msra.gmra.mrb[12].mxu1 %vm1042_vm7, %v5075_v4  ;;  %4444 = vmatprep.subr.bf16.mxu0 %v4821_v48 }
 0x5ca   : > { %4437 = vmatpush3.bf16.msra.mxu1 %v4665_v26  ;;  %4440 = vmatprep.mubr.msk.bf16.mxu1 %vm4822_vm8, %v4821_v48 }
 0x5cb   : > { %4433 = vmatmul.mubr.msk.bf16.vlgmr.msra.gmra.mrb[16].mxu0 %vm1042_vm7, %v5075_v4  ;;  %4438 = vmatprep.subr.bf16.mxu1 %v4821_v48 }
 0x5cc   : > { %4446 = vmatprep.mubr.msk.bf16.mxu0 %vm4822_vm8, %v4821_v48 }
 0x5ce   : > { %4439 = vmatpush3.bf16.msra.mxu1 %v4666_v27 }
 0x5cf   : > { %4450 = vmatprep.subr.bf16.mxu1 %v4821_v48 }
 0x5d1   : > { %4441 = vmatmul.mubr.msk.bf16.vlgmr.msra.gmra.mrb[16].mxu1 %vm1042_vm7, %v5075_v4 }
 0x5d2   : > { %4452 = vmatprep.mubr.msk.bf16.mxu1 %vm4822_vm8, %v4821_v48 }
 0x694   : > { %v5161_v28 = vpop.f32.mrb[8].mxu1 }
 0x695   : > { %v4412_v29 = vpop.f32.mrb[9].mxu1 }
 0x696   : > { %v1467_v30 = vpop.f32.mrb[10].mxu1  ;;  %v5163_v31 = vpop.f32.mrb[12].mxu0 }
 0x697   : > { %v1516_v32 = vpack.c.bf16 %v5163_v31, %v5161_v28  ;;  %v4413_v33 = vpop.f32.mrb[11].mxu1  ;;  %v4418_v34 = vpop.f32.mrb[13].mxu0 }
 0x698   : > { %v1513_v35 = vpop.f32.mrb[14].mxu0 }
 0x699   : > { %v4419_v36 = vpop.f32.mrb[15].mxu0 }
 0x69c   : > { %v1577_v37 = vpop.f32.mrb[12].mxu1 }
 0x69d   : > { %v4426_v39 = vpop.f32.mrb[13].mxu1  ;;  %v1578_v59 = vadd.f32 %v4059_v53, %v1577_v37 }
 0x69e   : > { %v1580_v40 = vpop.f32.mrb[14].mxu1  ;;  %v1643_v41 = vpop.f32.mrb[16].mxu0 }
 0x69f   : > { %v1644_v43 = vadd.f32 %v4068_v38, %v1643_v41  ;;  %v4427_v44 = vpop.f32.mrb[15].mxu1  ;;  %v4434_v45 = vpop.f32.mrb[17].mxu0  ;;  %v1581_v0 = vadd.f32 %v4059_v53, %v1580_v40  ;;  %v1716_v5 = vpack.c.bf16 %v1578_v59, %v1578_v59  ;;  %v4085_v40 = vld [vmem:[%s4978_s5 + $0x4] sm:$0xf] }
 0x6a0   : > { %v1646_v46 = vpop.f32.mrb[18].mxu0  ;;  %v1517_v44 = vld [vmem:[%s4978_s5] sm:$0xf] }
 0x6a1   : > { %v1718_v47 = vpack.c.bf16 %v1644_v43, %v1644_v43  ;;  %v1647_v50 = vadd.f32 %v4068_v38, %v1646_v46  ;;  %v4435_v52 = vpop.f32.mrb[19].mxu0  ;;  %v1717_v7 = vpack.c.bf16 %v1581_v0, %v1581_v0  ;;  %v4667_v53 = vld [vmem:[%s4983_s20 + $0x60] sm:$0xff]  }
 0x6a2   : > { %v1988_v52 = vsel %vm1426_vm10, %v1517_v44, 0 }
 0x6a3   : > { %v1726_v56 = vsel %vm1292_vm9, %v1718_v47, 0  ;;  %v1719_v57 = vpack.c.bf16 %v1647_v50, %v1647_v50  ;;  %v1941_v47 = vsel %vm1426_vm10, %v4085_v40, 0 }
 0x6a4   : > { %v1709_v58 = vpop.f32.mrb[16].mxu1  ;;  %4445 = vmatpush3.bf16.xpose.msra.mxu0 %v1726_v56 }
 0x6a5   : > { %v1772_v60 = vsel %vm1292_vm9, %v1719_v57, 0  ;;  %v1710_v61 = vadd.f32 %v4077_v54, %v1709_v58  ;;  %v4442_v62 = vpop.f32.mrb[17].mxu1  ;;  %4456 = vmatprep.subr.bf16.mxu0 %v4821_v48  ;;  %v4669_v57 = vld [vmem:[%s4983_s20 + $0x20] sm:$0xff]  }
 0x6a6   : > { %v1712_v63 = vpop.f32.mrb[18].mxu1  ;;  %4451 = vmatpush3.bf16.xpose.msra.mxu1 %v1772_v60 }
 0x6a7   : > { %v1720_v1 = vpack.c.bf16 %v1710_v61, %v1710_v61  ;;  %v1713_v2 = vadd.f32 %v4077_v54, %v1712_v63  ;;  %v4443_v3 = vpop.f32.mrb[19].mxu1  ;;  %4462 = vmatprep.subr.bf16.mxu1 %v4821_v48  ;;  %v4668_v54 = vld [vmem:[%s4983_s20 + $0x68] sm:$0xff]  }
 0x6a8   : > { %v4670_v63 = vld [vmem:[%s4983_s20 + $0x28] sm:$0xff]  }
 0x6a9   : > { %v1721_v6 = vpack.c.bf16 %v1713_v2, %v1713_v2  ;;  %v1846_v8 = vsel %vm1426_vm10, %v1720_v1, 0  ;;  %v4671_v1 = vld [vmem:[%s4983_s20 + $0xa0] sm:$0xff]  }
 0x6ab   : > { %4447 = vmatmul.mubr.msk.bf16.vlgmr.msra.gmra.mrb[20].mxu0 %vm1292_vm9, %v1716_v5  ;;  %v1892_v9 = vsel %vm1426_vm10, %v1721_v6, 0  ;;  %v4672_v6 = vld [vmem:[%s4983_s20 + $0xa8] sm:$0xff]  }
 0x6ac   : > { %4457 = vmatpush3.bf16.msra.mxu0 %v1846_v8  ;;  %4458 = vmatprep.mubr.msk.bf16.mxu0 %vm4822_vm8, %v4821_v48 }
 0x6ad   : > { %4453 = vmatmul.mubr.msk.bf16.vlgmr.msra.gmra.mrb[20].mxu1 %vm1292_vm9, %v1717_v7  ;;  %4468 = vmatprep.subr.bf16.mxu0 %v4821_v48  ;;  %v4102_v7 = vld [vmem:[%s4992_s6 + $0x6] ss:$0 sm:$0xff] }
 0x6ae   : > { %4463 = vmatpush3.bf16.msra.mxu1 %v1892_v9  ;;  %4464 = vmatprep.mubr.msk.bf16.mxu1 %vm4822_vm8, %v4821_v48 }
 0x6af   : > { %4474 = vmatprep.subr.bf16.mxu1 %v4821_v48 }
 0x77e   : > { %v1762_v10 = vpop.f32.mrb[20].mxu0 }
 0x77f   : > { %v1814_v11 = vmul.f32 0.35355338, %v1762_v10  ;;  %v4448_v12 = vpop.f32.mrb[21].mxu0 }
 0x780   : > { %v1765_v13 = vpop.f32.mrb[22].mxu0  ;;  %v1808_v14 = vpop.f32.mrb[20].mxu1 }
 0x781   : > { %v1815_v15 = vmul.f32 0.35355338, %v1808_v14  ;;  %v4449_v16 = vpop.f32.mrb[23].mxu0  ;;  %v4454_v17 = vpop.f32.mrb[21].mxu1  ;;  %v1816_v18 = vadd.f32 %v1814_v11, %v5120_v51 }
 0x782   : > { %v1811_v19 = vpop.f32.mrb[22].mxu1 }
 0x783   : > { %v4455_v20 = vpop.f32.mrb[23].mxu1  ;;  %v1818_v21 = vsel %vm1292_vm9, %v1816_v18, -inf  ;;  %v1817_v22 = vadd.f32 %v1815_v15, %v5123_v55 }
 0x784   : > { %1819 = vmax.xlane.f32.xlu0 %v1818_v21 }
 0x785   : > { %v1821_v23 = vsel %vm1292_vm9, %v1817_v22, -inf }
 0x786   : > { %1822 = vmax.xlane.f32.xlu1 %v1821_v23 }
 0x811   : > { %v1820_v24 = vpop.xlane.xlu0 %1819 }
 0x812   : > { %v1824_v25 = vsub.f32 %v1816_v18, %v1820_v24  ;;  %v4093_v24 = vld [vmem:[%s4992_s6 + $0x2] ss:$0 sm:$0xff] }
 0x813   : > { %v1823_v26 = vpop.xlane.xlu1 %1822 }
 0x814   : > { %v1826_v27 = vmul.f32 1.442695, %v1824_v25  ;;  %v1825_v29 = vsub.f32 %v1817_v22, %v1823_v26 }
 0x816   : > { %4697 = vpow2.f32 %v1826_v27  ;;  %v1828_v30 = vmul.f32 1.442695, %v1825_v29 }
 0x818   : > { %4699 = vpow2.f32 %v1828_v30 }
 0x820   : > { %v4698_v33 = vpop.eup %4697 }
 0x821   : > { %v1830_v34 = vsel %vm1292_vm9, %v4698_v33, 0.0 }
 0x822   : > { %v4700_v35 = vpop.eup %4699  ;;  %1831 = vadd.xlane.f32.xlu0 %v1830_v34 }
 0x823   : > { %v1833_v36 = vsel %vm1292_vm9, %v4700_v35, 0.0 }
 0x824   : > { %1834 = vadd.xlane.f32.xlu1 %v1833_v36  ;;  %v4111_v36 = vld [vmem:[%s4992_s6 + $0xa] ss:$0 sm:$0xff] }
 0x8af   : > { %v1832_v37 = vpop.xlane.xlu0 %1831 }
 0x8b0   : > { %4701 = vrcp.f32 %v1832_v37 }
 0x8b1   : > { %v1835_v38 = vpop.xlane.xlu1 %1834 }
 0x8b2   : > { %4703 = vrcp.f32 %v1835_v38 }
 0x8ba   : > { %v4702_v39 = vpop.eup %4701 }
 0x8bb   : > { %v1837_v41 = vmul.f32 %v4702_v39, %v4698_v33 }
 0x8bc   : > { %v4704_v43 = vpop.eup %4703 }
 0x8bd   : > { %v1839_v45 = vmul.f32 %v4704_v43, %v4700_v35  ;;  %v1840_v46 = vpack.c.bf16 %v1837_v41, %v1837_v41 }
 0x8bf   : > { %4459 = vmatmul.mubr.msk.bf16.vlgmr.msra.gmra.mrb[24].mxu0 %vm1292_vm9, %v1840_v46  ;;  %v1841_v50 = vpack.c.bf16 %v1839_v45, %v1839_v45 }
 0x8c0   : > { %4469 = vmatpush3.bf16.msra.mxu0 %v1941_v47  ;;  %4470 = vmatprep.mubr.msk.bf16.mxu0 %vm4822_vm8, %v4821_v48 }
 0x8c1   : > { %4465 = vmatmul.mubr.msk.bf16.vlgmr.msra.gmra.mrb[24].mxu1 %vm1292_vm9, %v1841_v50  ;;  %4480 = vmatprep.subr.bf16.mxu0 %v4821_v48 }
 0x8c2   : > { %4475 = vmatpush3.bf16.msra.mxu1 %v1988_v52  ;;  %4476 = vmatprep.mubr.msk.bf16.mxu1 %vm4822_vm8, %v4821_v48 }
 0x8c3   : > { %4488 = vmatprep.subr.bf16.mxu1 %v4821_v48 }
 0x8c9   : > { %4477 = vmatmul.mubr.msk.bf16.vlgmr.msra.gmra.mrb[28].mxu1 %vm1292_vm9, %v1516_v32 }
 0x8ca   : > { %4489 = vmatpush3.bf16.msra.mxu1 %v4667_v53  ;;  %4492 = vmatprep.mubr.msk.bf16.mxu1 %vm4822_vm8, %v4821_v48 }
 0x8cb   : > { %4490 = vmatprep.subr.bf16.mxu1 %v4821_v48 }
 0x8ce   : > { %4491 = vmatpush3.bf16.msra.mxu1 %v4668_v54 }
 0x8cf   : > { %4504 = vmatprep.subr.bf16.mxu1 %v4821_v48 }
 0x8d1   : > { %4493 = vmatmul.mubr.msk.bf16.vlgmr.msra.gmra.mrb[32].mxu1 %vm1042_vm7, %v5075_v4 }
 0x8d2   : > { %4506 = vmatprep.mubr.msk.bf16.mxu1 %vm4822_vm8, %v4821_v48 }
 0x992   : > { %v1882_v28 = vpop.f32.mrb[24].mxu0 }
 0x993   : > { %v4460_v31 = vpop.f32.mrb[25].mxu0 }
 0x994   : > { %v1885_v32 = vpop.f32.mrb[26].mxu0  ;;  %v1928_v56 = vpop.f32.mrb[24].mxu1 }
 0x995   : > { %v1934_v58 = vpack.c.bf16 %v1928_v56, %v1882_v28  ;;  %v4461_v59 = vpop.f32.mrb[27].mxu0  ;;  %v4466_v60 = vpop.f32.mrb[25].mxu1 }
 0x996   : > { %v1931_v61 = vpop.f32.mrb[26].mxu1 }
 0x997   : > { %v4467_v62 = vpop.f32.mrb[27].mxu1  ;;  %4471 = vmatmul.mubr.msk.bf16.vlgmr.msra.gmra.mrb[28].mxu0 %vm1292_vm9, %v1934_v58 }
 0x998   : > { %4481 = vmatpush3.bf16.msra.mxu0 %v4669_v57  ;;  %4484 = vmatprep.mubr.msk.bf16.mxu0 %vm4822_vm8, %v4821_v48 }
 0x999   : > { %4482 = vmatprep.subr.bf16.mxu0 %v4821_v48 }
 0x99c   : > { %4483 = vmatpush3.bf16.msra.mxu0 %v4670_v63  ;;  %v2024_v0 = vpop.f32.mrb[28].mxu1 }
 0x99d   : > { %v4478_v2 = vpop.f32.mrb[29].mxu1  ;;  %4496 = vmatprep.subr.bf16.mxu0 %v4821_v48 }
 0x99e   : > { %v2027_v3 = vpop.f32.mrb[30].mxu1 }
 0x99f   : > { %v4479_v5 = vpop.f32.mrb[31].mxu1  ;;  %4485 = vmatmul.mubr.msk.bf16.vlgmr.msra.gmra.mrb[32].mxu0 %vm1042_vm7, %v5075_v4 }
 0x9a0   : > { %4497 = vmatpush3.bf16.msra.mxu0 %v4671_v1  ;;  %4500 = vmatprep.mubr.msk.bf16.mxu0 %vm4822_vm8, %v4821_v48 }
 0x9a1   : > { %4498 = vmatprep.subr.bf16.mxu0 %v4821_v48 }
 0x9a4   : > { %4499 = vmatpush3.bf16.msra.mxu0 %v4672_v6  ;;  %v2156_v8 = vpop.f32.mrb[32].mxu1 }
 0x9a5   : > { %v2157_v9 = vadd.f32 %v4102_v7, %v2156_v8  ;;  %v4494_v10 = vpop.f32.mrb[33].mxu1  ;;  %4510 = vmatprep.subr.bf16.mxu0 %v4821_v48 }
 0x9a6   : > { %v2159_v11 = vpop.f32.mrb[34].mxu1 }
 0x9a7   : > { %v2231_v12 = vpack.c.bf16 %v2157_v9, %v2157_v9  ;;  %v2160_v13 = vadd.f32 %v4102_v7, %v2159_v11  ;;  %v4495_v14 = vpop.f32.mrb[35].mxu1  ;;  %4501 = vmatmul.mubr.msk.bf16.vlgmr.msra.gmra.mrb[36].mxu0 %vm1042_vm7, %v5075_v4 }
 0x9a8   : > { %4512 = vmatprep.mubr.msk.bf16.mxu0 %vm4822_vm8, %v4821_v48 }
 0x9a9   : > { %v2239_v15 = vsel %vm1292_vm9, %v2231_v12, 0  ;;  %v2232_v16 = vpack.c.bf16 %v2160_v13, %v2160_v13  ;;  %v4119_v13 = vld [vmem:[%s4978_s5 + $0x8] sm:$0xf] }
 0x9aa   : > { %4505 = vmatpush3.bf16.xpose.msra.mxu1 %v2239_v15 }
 0x9ab   : > { %v2285_v17 = vsel %vm1292_vm9, %v2232_v16, 0  ;;  %4516 = vmatprep.subr.bf16.mxu1 %v4821_v48 }
 0x9ad   : > { %4511 = vmatpush3.bf16.xpose.msra.mxu0 %v2285_v17 }
 0x9ae   : > { %4522 = vmatprep.subr.bf16.mxu0 %v4821_v48 }
 0xa6a   : > { %v1977_v18 = vpop.f32.mrb[28].mxu0 }
 0xa6b   : > { %v5240_v19 = vadd.f32 %v2024_v0, %v1977_v18  ;;  %v4472_v20 = vpop.f32.mrb[29].mxu0  ;;  %v2454_v18 = vsel %vm1426_vm10, %v4119_v13, 0 }
 0xa6c   : > { %v1980_v21 = vpop.f32.mrb[30].mxu0  ;;  %v4673_v20 = vld [vmem:[%s4983_s20 + $0x30] sm:$0xff]  }
 0xa6d   : > { %v5242_v22 = vadd.f32 %v2027_v3, %v1980_v21  ;;  %v4473_v23 = vpop.f32.mrb[31].mxu0 }
 0xa6e   : > { %v4674_v23 = vld [vmem:[%s4983_s20 + $0x38] sm:$0xff]  }
 0xa72   : > { %v2090_v25 = vpop.f32.mrb[32].mxu0 }
 0xa73   : > { %v2091_v26 = vadd.f32 %v4093_v24, %v2090_v25  ;;  %v4486_v27 = vpop.f32.mrb[33].mxu0  ;;  %v4676_v25 = vld [vmem:[%s4983_s20 + $0xb8] sm:$0xff]  }
 0xa74   : > { %v2093_v29 = vpop.f32.mrb[34].mxu0 }
 0xa75   : > { %v2229_v30 = vpack.c.bf16 %v2091_v26, %v2091_v26  ;;  %v2094_v33 = vadd.f32 %v4093_v24, %v2093_v29  ;;  %v4487_v34 = vpop.f32.mrb[35].mxu0  ;;  %v4675_v24 = vld [vmem:[%s4983_s20 + $0xb0] sm:$0xff]  }
 0xa77   : > { %v2230_v35 = vpack.c.bf16 %v2094_v33, %v2094_v33  ;;  %4507 = vmatmul.mubr.msk.bf16.vlgmr.msra.gmra.mrb[36].mxu1 %vm1292_vm9, %v2229_v30  ;;  %v4677_v33 = vld [vmem:[%s4983_s20 + $0x70] sm:$0xff]  }
 0xa78   : > { %4518 = vmatprep.mubr.msk.bf16.mxu1 %vm4822_vm8, %v4821_v48 }
 0xa79   : > { %4513 = vmatmul.mubr.msk.bf16.vlgmr.msra.gmra.mrb[40].mxu0 %vm1292_vm9, %v2230_v35 }
 0xa7a   : > { %v2222_v37 = vpop.f32.mrb[36].mxu0  ;;  %4524 = vmatprep.mubr.msk.bf16.mxu0 %vm4822_vm8, %v4821_v48 }
 0xa7b   : > { %v2223_v38 = vadd.f32 %v4111_v36, %v2222_v37  ;;  %v4502_v39 = vpop.f32.mrb[37].mxu0 }
 0xa7c   : > { %v2225_v40 = vpop.f32.mrb[38].mxu0  ;;  %v4678_v39 = vld [vmem:[%s4983_s20 + $0x78] sm:$0xff]   ;;  %s5622_s20 = sld [smem:[#allocation16_spill]] (!%p4167_p5) }
 0xa7d   : > { %v2233_v41 = vpack.c.bf16 %v2223_v38, %v2223_v38  ;;  %v2226_v43 = vadd.f32 %v4111_v36, %v2225_v40  ;;  %v4503_v44 = vpop.f32.mrb[39].mxu0 }
 0xa7f   : > { %v2359_v45 = vsel %vm1426_vm10, %v2233_v41, 0  ;;  %v2234_v46 = vpack.c.bf16 %v2226_v43, %v2226_v43 }
 0xa80   : > { %4517 = vmatpush3.bf16.msra.mxu1 %v2359_v45 }
 0xa81   : > { %v2405_v47 = vsel %vm1426_vm10, %v2234_v46, 0  ;;  %4528 = vmatprep.subr.bf16.mxu1 %v4821_v48 }
 0xa82   : > { %4523 = vmatpush3.bf16.msra.mxu0 %v2405_v47 }
 0xa83   : > { %4534 = vmatprep.subr.bf16.mxu0 %v4821_v48 }
 0xb4a   : > { %v2275_v50 = vpop.f32.mrb[36].mxu1 }
 0xb4b   : > { %v2327_v52 = vmul.f32 0.35355338, %v2275_v50  ;;  %v4508_v53 = vpop.f32.mrb[37].mxu1 }
 0xb4c   : > { %v2278_v54 = vpop.f32.mrb[38].mxu1  ;;  %v2321_v28 = vpop.f32.mrb[40].mxu0 }
 0xb4d   : > { %v2328_v31 = vmul.f32 0.35355338, %v2321_v28  ;;  %v4509_v32 = vpop.f32.mrb[39].mxu1  ;;  %v4514_v56 = vpop.f32.mrb[41].mxu0  ;;  %v2329_v57 = vadd.f32 %v2327_v52, %v5120_v51 }
 0xb4e   : > { %v2324_v58 = vpop.f32.mrb[42].mxu0 }
 0xb4f   : > { %v4515_v59 = vpop.f32.mrb[43].mxu0  ;;  %v2331_v60 = vsel %vm1292_vm9, %v2329_v57, -inf  ;;  %v2330_v61 = vadd.f32 %v2328_v31, %v5123_v55 }
 0xb50   : > { %2332 = vmax.xlane.f32.xlu0 %v2331_v60  ;;  %v4144_v59 = vld [vmem:[%s4992_s6 + $0xb] ss:$0 sm:$0xff] }
 0xb51   : > { %v2334_v62 = vsel %vm1292_vm9, %v2330_v61, -inf }
 0xb52   : > { %2335 = vmax.xlane.f32.xlu1 %v2334_v62 }
 0xbdd   : > { %v2333_v63 = vpop.xlane.xlu0 %2332 }
 0xbde   : > { %v2337_v0 = vsub.f32 %v2329_v57, %v2333_v63 }
 0xbdf   : > { %v2336_v1 = vpop.xlane.xlu1 %2335 }
 0xbe0   : > { %v2339_v2 = vmul.f32 1.442695, %v2337_v0  ;;  %v2338_v3 = vsub.f32 %v2330_v61, %v2336_v1  ;;  %v4126_v0 = vld [vmem:[%s4992_s6 + $0x3] ss:$0 sm:$0xff] }
 0xbe2   : > { %4705 = vpow2.f32 %v2339_v2  ;;  %v2341_v5 = vmul.f32 1.442695, %v2338_v3 }
 0xbe4   : > { %4707 = vpow2.f32 %v2341_v5 }
 0xbec   : > { %v4706_v6 = vpop.eup %4705 }
 0xbed   : > { %v2343_v7 = vsel %vm1292_vm9, %v4706_v6, 0.0 }
 0xbee   : > { %v4708_v8 = vpop.eup %4707  ;;  %2344 = vadd.xlane.f32.xlu0 %v2343_v7 }
 0xbef   : > { %v2346_v9 = vsel %vm1292_vm9, %v4708_v8, 0.0 }
 0xbf0   : > { %2347 = vadd.xlane.f32.xlu1 %v2346_v9 }
 0xc7b   : > { %v2345_v10 = vpop.xlane.xlu0 %2344 }
 0xc7c   : > { %4709 = vrcp.f32 %v2345_v10 }
 0xc7d   : > { %v2348_v11 = vpop.xlane.xlu1 %2347 }
 0xc7e   : > { %4711 = vrcp.f32 %v2348_v11 }
 0xc86   : > { %v4710_v12 = vpop.eup %4709 }
 0xc87   : > { %v2350_v14 = vmul.f32 %v4710_v12, %v4706_v6 }
 0xc88   : > { %v4712_v15 = vpop.eup %4711 }
 0xc89   : > { %v2352_v16 = vmul.f32 %v4712_v15, %v4708_v8  ;;  %v2353_v17 = vpack.c.bf16 %v2350_v14, %v2350_v14 }
 0xc8b   : > { %4519 = vmatmul.mubr.msk.bf16.vlgmr.msra.gmra.mrb[40].mxu1 %vm1292_vm9, %v2353_v17  ;;  %v2354_v21 = vpack.c.bf16 %v2352_v16, %v2352_v16 }
 0xc8c   : > { %4529 = vmatpush3.bf16.msra.mxu1 %v2454_v18  ;;  %4530 = vmatprep.mubr.msk.bf16.mxu1 %vm4822_vm8, %v4821_v48 }
 0xc8d   : > { %4525 = vmatmul.mubr.msk.bf16.vlgmr.msra.gmra.mrb[44].mxu0 %vm1292_vm9, %v2354_v21  ;;  %4542 = vmatprep.subr.bf16.mxu1 %v4821_v48 }
 0xc8e   : > { %4535 = vmatpush3.bf16.msra.mxu0 %v4673_v20  ;;  %4538 = vmatprep.mubr.msk.bf16.mxu0 %vm4822_vm8, %v4821_v48 }
 0xc8f   : > { %4536 = vmatprep.subr.bf16.mxu0 %v4821_v48 }
 0xc92   : > { %4537 = vmatpush3.bf16.msra.mxu0 %v4674_v23 }
 0xc93   : > { %4550 = vmatprep.subr.bf16.mxu0 %v4821_v48 }
 0xc95   : > { %4539 = vmatmul.mubr.msk.bf16.vlgmr.msra.gmra.mrb[48].mxu0 %vm1042_vm7, %v5075_v4 }
 0xc96   : > { %4551 = vmatpush3.bf16.msra.mxu0 %v4675_v24  ;;  %4554 = vmatprep.mubr.msk.bf16.mxu0 %vm4822_vm8, %v4821_v48 }
 0xc97   : > { %4552 = vmatprep.subr.bf16.mxu0 %v4821_v48 }
 0xc9a   : > { %4553 = vmatpush3.bf16.msra.mxu0 %v4676_v25 }
 0xc9b   : > { %4564 = vmatprep.subr.bf16.mxu0 %v4821_v48 }
 0xc9d   : > { %4555 = vmatmul.mubr.msk.bf16.vlgmr.msra.gmra.mrb[52].mxu0 %vm1042_vm7, %v5075_v4 }
 0xc9e   : > { %4566 = vmatprep.mubr.msk.bf16.mxu0 %vm4822_vm8, %v4821_v48 }
 0xd5e   : > { %v2395_v26 = vpop.f32.mrb[40].mxu1 }
 0xd5f   : > { %v4520_v27 = vpop.f32.mrb[41].mxu1 }
 0xd60   : > { %v2398_v29 = vpop.f32.mrb[42].mxu1  ;;  %v2441_v30 = vpop.f32.mrb[44].mxu0 }
 0xd61   : > { %v2447_v34 = vpack.c.bf16 %v2441_v30, %v2395_v26  ;;  %v4521_v35 = vpop.f32.mrb[43].mxu1  ;;  %v4526_v36 = vpop.f32.mrb[45].mxu0 }
 0xd62   : > { %v2444_v37 = vpop.f32.mrb[46].mxu0 }
 0xd63   : > { %v4527_v38 = vpop.f32.mrb[47].mxu0  ;;  %4531 = vmatmul.mubr.msk.bf16.vlgmr.msra.gmra.mrb[44].mxu1 %vm1292_vm9, %v2447_v34 }
 0xd64   : > { %4543 = vmatpush3.bf16.msra.mxu1 %v4677_v33  ;;  %4546 = vmatprep.mubr.msk.bf16.mxu1 %vm4822_vm8, %v4821_v48 }
 0xd65   : > { %4544 = vmatprep.subr.bf16.mxu1 %v4821_v48 }
 0xd68   : > { %v2558_v40 = vpop.f32.mrb[48].mxu0  ;;  %4545 = vmatpush3.bf16.msra.mxu1 %v4678_v39 }
 0xd69   : > { %v4540_v41 = vpop.f32.mrb[49].mxu0  ;;  %4558 = vmatprep.subr.bf16.mxu1 %v4821_v48  ;;  %v2559_v3 = vadd.f32 %v4126_v0, %v2558_v40 }
 0xd6a   : > { %v2561_v43 = vpop.f32.mrb[50].mxu0 }
 0xd6b   : > { %v4541_v44 = vpop.f32.mrb[51].mxu0  ;;  %4547 = vmatmul.mubr.msk.bf16.vlgmr.msra.gmra.mrb[48].mxu1 %vm1042_vm7, %v5075_v4  ;;  %v4135_v4 = vld [vmem:[%s4992_s6 + $0x7] ss:$0 sm:$0xff]  ;;  %v2562_v6 = vadd.f32 %v4126_v0, %v2561_v43  ;;  %v2697_v8 = vpack.c.bf16 %v2559_v3, %v2559_v3  ;;  %s5618_s6 = scalar_lea.vmem %s5571_s10, %s4962_s24  ;;  %s5624_s24 = sld [smem:[#allocation18_spill]] (!%p4167_p5) }
 0xd6c   : > { %4560 = vmatprep.mubr.msk.bf16.mxu1 %vm4822_vm8, %v4821_v48  ;;  %v4152_v44 = vld [vmem:[%s4978_s5 + $0xc] sm:$0xf] }
 0xd6d   : > { %v2698_v10 = vpack.c.bf16 %v2562_v6, %v2562_v6 }
 0xd70   : > { %v2690_v45 = vpop.f32.mrb[52].mxu0 }
 0xd71   : > { %v4556_v46 = vpop.f32.mrb[53].mxu0  ;;  %v2691_v1 = vadd.f32 %v4144_v59, %v2690_v45 }
 0xd72   : > { %v2693_v47 = vpop.f32.mrb[54].mxu0 }
 0xd73   : > { %v4557_v50 = vpop.f32.mrb[55].mxu0  ;;  %v2694_v5 = vadd.f32 %v4144_v59, %v2693_v47  ;;  %v2701_v7 = vpack.c.bf16 %v2691_v1, %v2691_v1  ;;  %v4154_v1 = vld [vmem:[%s5618_s6] ss:$0 sm:$0xff] }
 0xd75   : > { %v2702_v9 = vpack.c.bf16 %v2694_v5, %v2694_v5  ;;  %v2827_v11 = vsel %vm1426_vm10, %v2701_v7, 0  ;;  %v4734_v7 = vld [vmem:[#allocation2 + $0x8] sm:$0xff] }
 0xd77   : > { %v2873_v12 = vsel %vm1426_vm10, %v2702_v9, 0 }
 0xe36   : > { %v2490_v52 = vpop.f32.mrb[44].mxu1 }
 0xe37   : > { %v5299_v53 = vadd.f32 %v2490_v52, %v5240_v19  ;;  %v4532_v54 = vpop.f32.mrb[45].mxu1  ;;  %v2922_v52 = vsel %vm1426_vm10, %v4152_v44, 0  ;;  %v4682_v44 = vld [vmem:[%s5015_s1 + $0x8] sm:$0xff]  }
 0xe38   : > { %v2493_v28 = vpop.f32.mrb[46].mxu1 }
 0xe39   : > { %v5302_v31 = vadd.f32 %v2493_v28, %v5242_v22  ;;  %v4533_v32 = vpop.f32.mrb[47].mxu1 }
 0xe3e   : > { %v2624_v56 = vpop.f32.mrb[48].mxu1 }
 0xe3f   : > { %v2625_v57 = vadd.f32 %v4135_v4, %v2624_v56  ;;  %v4548_v58 = vpop.f32.mrb[49].mxu1 }
 0xe40   : > { %v2627_v60 = vpop.f32.mrb[50].mxu1 }
 0xe41   : > { %v2699_v61 = vpack.c.bf16 %v2625_v57, %v2625_v57  ;;  %v2628_v62 = vadd.f32 %v4135_v4, %v2627_v60  ;;  %v4549_v63 = vpop.f32.mrb[51].mxu1 }
 0xe43   : > { %v2707_v19 = vsel %vm1292_vm9, %v2699_v61, 0  ;;  %v2700_v2 = vpack.c.bf16 %v2628_v62, %v2628_v62 }
 0xe44   : > { %4559 = vmatpush3.bf16.xpose.msra.mxu1 %v2707_v19 }
 0xe45   : > { %v2753_v22 = vsel %vm1292_vm9, %v2700_v2, 0  ;;  %4570 = vmatprep.subr.bf16.mxu1 %v4821_v48  ;;  %v4733_v2 = vld [vmem:[#allocation2] sm:$0xff] }
 0xe46   : > { %4565 = vmatpush3.bf16.xpose.msra.mxu0 %v2753_v22 }
 0xe47   : > { %4576 = vmatprep.subr.bf16.mxu0 %v4821_v48 }
 0xe4b   : > { %4561 = vmatmul.mubr.msk.bf16.vlgmr.msra.gmra.mrb[52].mxu1 %vm1292_vm9, %v2697_v8 }
 0xe4c   : > { %4571 = vmatpush3.bf16.msra.mxu1 %v2827_v11  ;;  %4572 = vmatprep.mubr.msk.bf16.mxu1 %vm4822_vm8, %v4821_v48 }
 0xe4d   : > { %4567 = vmatmul.mubr.msk.bf16.vlgmr.msra.gmra.mrb[56].mxu0 %vm1292_vm9, %v2698_v10  ;;  %4582 = vmatprep.subr.bf16.mxu1 %v4821_v48 }
 0xe4e   : > { %4577 = vmatpush3.bf16.msra.mxu0 %v2873_v12  ;;  %4578 = vmatprep.mubr.msk.bf16.mxu0 %vm4822_vm8, %v4821_v48 }
 0xe4f   : > { %4588 = vmatprep.subr.bf16.mxu0 %v4821_v48 }
 0xf1e   : > { %v2743_v13 = vpop.f32.mrb[52].mxu1 }
 0xf1f   : > { %v2795_v14 = vmul.f32 0.35355338, %v2743_v13  ;;  %v4562_v15 = vpop.f32.mrb[53].mxu1 }
 0xf20   : > { %v2746_v16 = vpop.f32.mrb[54].mxu1  ;;  %v2789_v17 = vpop.f32.mrb[56].mxu0 }
 0xf21   : > { %v2796_v18 = vmul.f32 0.35355338, %v2789_v17  ;;  %v4563_v20 = vpop.f32.mrb[55].mxu1  ;;  %v4568_v21 = vpop.f32.mrb[57].mxu0  ;;  %v2797_v23 = vadd.f32 %v2795_v14, %v5120_v51 }
 0xf22   : > { %v2792_v24 = vpop.f32.mrb[58].mxu0  ;;  %v4679_v21 = vld [vmem:[%s5005_s4] sm:$0xff]  }
 0xf23   : > { %v4569_v25 = vpop.f32.mrb[59].mxu0  ;;  %v2799_v26 = vsel %vm1292_vm9, %v2797_v23, -inf  ;;  %v2798_v27 = vadd.f32 %v2796_v18, %v5123_v55 }
 0xf24   : > { %2800 = vmax.xlane.f32.xlu0 %v2799_v26 }
 0xf25   : > { %v2802_v29 = vsel %vm1292_vm9, %v2798_v27, -inf }
 0xf26   : > { %2803 = vmax.xlane.f32.xlu1 %v2802_v29 }
 0xfb1   : > { %v2801_v30 = vpop.xlane.xlu0 %2800 }
 0xfb2   : > { %v2805_v33 = vsub.f32 %v2797_v23, %v2801_v30  ;;  %v4680_v23 = vld [vmem:[%s5005_s4 + $0x8] sm:$0xff]  }
 0xfb3   : > { %v2804_v34 = vpop.xlane.xlu1 %2803 }
 0xfb4   : > { %v2807_v35 = vmul.f32 1.442695, %v2805_v33  ;;  %v2806_v36 = vsub.f32 %v2798_v27, %v2804_v34  ;;  %v4155_v34 = vld [vmem:[%s852_s0] ss:$0 sm:$0xff] }
 0xfb6   : > { %4713 = vpow2.f32 %v2807_v35  ;;  %v2809_v37 = vmul.f32 1.442695, %v2806_v36 }
 0xfb8   : > { %4715 = vpow2.f32 %v2809_v37 }
 0xfc0   : > { %v4714_v51 = vpop.eup %4713 }
 0xfc1   : > { %v2811_v38 = vsel %vm1292_vm9, %v4714_v51, 0.0 }
 0xfc2   : > { %v4716_v39 = vpop.eup %4715  ;;  %2812 = vadd.xlane.f32.xlu0 %v2811_v38  ;;  %v4156_v38 = vld [vmem:[%s855_s21] ss:$0 sm:$0xff] }
 0xfc3   : > { %v2814_v55 = vsel %vm1292_vm9, %v4716_v39, 0.0 }
 0xfc4   : > { %2815 = vadd.xlane.f32.xlu1 %v2814_v55 }
0x104f   : > { %v2813_v40 = vpop.xlane.xlu0 %2812 }
0x1050   : > { %4717 = vrcp.f32 %v2813_v40 }
0x1051   : > { %v2816_v41 = vpop.xlane.xlu1 %2815 }
0x1052   : > { %4719 = vrcp.f32 %v2816_v41 }
0x105a   : > { %v4718_v43 = vpop.eup %4717 }
0x105b   : > { %v2818_v45 = vmul.f32 %v4718_v43, %v4714_v51  ;;  %v4681_v43 = vld [vmem:[%s5015_s1] sm:$0xff]  }
0x105c   : > { %v4720_v46 = vpop.eup %4719 }
0x105d   : > { %v2820_v47 = vmul.f32 %v4720_v46, %v4716_v39  ;;  %v2821_v50 = vpack.c.bf16 %v2818_v45, %v2818_v45  ;;  %v4683_v45 = vld [vmem:[%s5015_s1 + $0x10] sm:$0xff]   ;;  %v4684_v46 = vld [vmem:[%s5015_s1 + $0x18] sm:$0xff]  }
0x105f   : > { %4573 = vmatmul.mubr.msk.bf16.vlgmr.msra.gmra.mrb[56].mxu1 %vm1292_vm9, %v2821_v50  ;;  %v2822_v54 = vpack.c.bf16 %v2820_v47, %v2820_v47  ;;  %v4157_v47 = vld [vmem:[%s863_s28] ss:$0 sm:$0xff] }
0x1060   : > { %4583 = vmatpush3.bf16.msra.mxu1 %v2922_v52  ;;  %4584 = vmatprep.mubr.msk.bf16.mxu1 %vm4822_vm8, %v4821_v48 }
0x1061   : > { %4579 = vmatmul.mubr.msk.bf16.vlgmr.msra.gmra.mrb[60].mxu0 %vm1292_vm9, %v2822_v54  ;;  %4596 = vmatprep.subr.bf16.mxu1 %v4821_v48 }
0x1062   : > { %4592 = vmatprep.mubr.msk.bf16.mxu0 %vm4822_vm8, %v4821_v48  ;;  %4589 = vmatpush3.bf16.msra.mxu0 %v4679_v21 }
0x1063   : > { %4590 = vmatprep.subr.bf16.mxu0 %v4821_v48 }
0x1066   : > { %4591 = vmatpush3.bf16.msra.mxu0 %v4680_v23 }
0x1132   : > { %v2863_v28 = vpop.f32.mrb[56].mxu1 }
0x1133   : > { %v4574_v32 = vpop.f32.mrb[57].mxu1 }
0x1134   : > { %v2866_v4 = vpop.f32.mrb[58].mxu1  ;;  %v2909_v56 = vpop.f32.mrb[60].mxu0 }
0x1135   : > { %v2915_v57 = vpack.c.bf16 %v2909_v56, %v2863_v28  ;;  %v4575_v58 = vpop.f32.mrb[59].mxu1  ;;  %v4580_v59 = vpop.f32.mrb[61].mxu0 }
0x1136   : > { %v2912_v60 = vpop.f32.mrb[62].mxu0 }
0x1137   : > { %v4581_v61 = vpop.f32.mrb[63].mxu0  ;;  %4585 = vmatmul.mubr.msk.bf16.vlgmr.msra.gmra.mrb[60].mxu1 %vm1292_vm9, %v2915_v57 }
0x1138   : > { %4604 = vmatprep.mubr.msk.bf16.mxu1 %vm4822_vm8, %v4821_v48  ;;  %4597 = vmatpush3.bf16.msra.mxu1 %v4681_v43 }
0x1139   : > { %4598 = vmatprep.subr.bf16.mxu1 %v4821_v48 }
0x113c   : > { %4599 = vmatpush3.bf16.msra.mxu1 %v4682_v44 }
0x113d   : > { %4600 = vmatprep.subr.bf16.mxu1 %v4821_v48 }
0x1140   : > { %4601 = vmatpush3.bf16.msra.mxu1 %v4683_v45 }
0x1141   : > { %4602 = vmatprep.subr.bf16.mxu1 %v4821_v48 }
0x1144   : > { %4603 = vmatpush3.bf16.msra.mxu1 %v4684_v46  ;;  %v4161_v46 = vld [vmem:[%s5619_s29] ss:$0 sm:$0xff] }
0x120a   : > { %v2958_v62 = vpop.f32.mrb[60].mxu1 }
0x120b   : > { %v2965_v63 = vadd.f32 %v2958_v62, %v5299_v53  ;;  %v4586_v0 = vpop.f32.mrb[61].mxu1 }
0x120c   : > { %v2961_v19 = vpop.f32.mrb[62].mxu1 }
0x120d   : > { %v2967_v3 = vadd.f32 %v4733_v2, %v2965_v63  ;;  %v2966_v5 = vadd.f32 %v2961_v19, %v5302_v31  ;;  %v4587_v22 = vpop.f32.mrb[63].mxu1 }
0x120f   : > { %v5346_v6 = vadd.f32 %v4154_v1, %v2967_v3  ;;  %v2968_v8 = vadd.f32 %v4734_v7, %v2966_v5 }
0x1211   : > { %v5348_v9 = vadd.f32 %v4154_v1, %v2968_v8  ;;  %v2980_v53 = vsel %vm1042_vm7, %v5346_v6, 0.0 }
0x1212   : > { %2981 = vadd.xlane.f32.xlu0 %v2980_v53 }
0x1213   : > { %v2983_v10 = vsel %vm1042_vm7, %v5348_v9, 0.0 }
0x1214   : > { %2984 = vadd.xlane.f32.xlu1 %v2983_v10 }
0x129f   : > { %v2982_v11 = vpop.xlane.xlu0 %2981 }
0x12a0   : > { %v2986_v12 = vmul.f32 0.03125, %v2982_v11 }
0x12a1   : > { %v2985_v31 = vpop.xlane.xlu1 %2984 }
0x12a2   : > { %v2988_v13 = vsub.f32 %v5346_v6, %v2986_v12  ;;  %v2987_v14 = vmul.f32 0.03125, %v2985_v31 }
0x12a4   : > { %v2989_v15 = vsub.f32 %v5348_v9, %v2987_v14  ;;  %v2990_v16 = vmul.f32 %v2988_v13, %v2988_v13 }
0x12a6   : > { %v2992_v17 = vsel %vm1042_vm7, %v2990_v16, 0.0  ;;  %v2991_v18 = vmul.f32 %v2989_v15, %v2989_v15 }
0x12a7   : > { %2993 = vadd.xlane.f32.xlu0 %v2992_v17 }
0x12a8   : > { %v2995_v20 = vsel %vm1042_vm7, %v2991_v18, 0.0 }
0x12a9   : > { %2996 = vadd.xlane.f32.xlu1 %v2995_v20 }
0x1334   : > { %v2994_v24 = vpop.xlane.xlu0 %2993 }
0x1335   : > { %v2998_v25 = vmul.f32 0.03125, %v2994_v24 }
0x1336   : > { %v2997_v26 = vpop.xlane.xlu1 %2996 }
0x1337   : > { %v3000_v27 = vadd.f32 1e-05, %v2998_v25  ;;  %v2999_v29 = vmul.f32 0.03125, %v2997_v26 }
0x1339   : > { %4721 = vrsqrt.f32 %v3000_v27  ;;  %v3001_v30 = vadd.f32 1e-05, %v2999_v29 }
0x133b   : > { %4723 = vrsqrt.f32 %v3001_v30 }
0x1343   : > { %v4722_v33 = vpop.eup %4721 }
0x1344   : > { %v3004_v35 = vmul.f32 %v4722_v33, %v2988_v13  ;;  %v4824_v33 = vmov -1.0  }
0x1345   : > { %v4724_v36 = vpop.eup %4723 }
0x1346   : > { %v3012_v37 = vmul.f32 %v4155_v34, %v3004_v35  ;;  %v3005_v51 = vmul.f32 %v4724_v36, %v2989_v15 }
0x1348   : > { %v3013_v39 = vmul.f32 %v4155_v34, %v3005_v51  ;;  %v3020_v55 = vadd.f32 %v4156_v38, %v3012_v37 }
0x134a   : > { %v3021_v40 = vadd.f32 %v4156_v38, %v3013_v39 }
0x134c   : > { %v3022_v41 = vpack.c.bf16 %v3021_v40, %v3020_v55 }
0x134e   : > { %4593 = vmatmul.mubr.msk.bf16.vlgmr.msra.gmra.mrb[64].mxu0 %vm1042_vm7, %v3022_v41 }
0x1421   : > { %v3083_v50 = vpop.f32.mrb[64].mxu0 }
0x1422   : > { %v3084_v52 = vadd.f32 %v4157_v47, %v3083_v50  ;;  %v4594_v54 = vpop.f32.mrb[65].mxu0 }
0x1423   : > { %v3086_v28 = vpop.f32.mrb[66].mxu0 }
0x1424   : > { %v3092_v32 = vmul.f32 0.70710677, %v3084_v52  ;;  %v3087_v4 = vadd.f32 %v4157_v47, %v3086_v28  ;;  %v4595_v56 = vpop.f32.mrb[67].mxu0  ;;  %v3090_v55 = vmul.f32 0.5, %v3084_v52 }
0x1426   : > { %v3098_v57 = vand.u32 2147483647, %v3092_v32  ;;  %v3093_v58 = vmul.f32 0.70710677, %v3087_v4  ;;  %vm3094_vm12 = vcmp.ge.f32.partialorder %v3092_v32, 0.0  ;;  %v3091_v40 = vmul.f32 0.5, %v3087_v4 }
0x1427   : > { %v3096_v34 = vsel %vm3094_vm12, 1.0, %v4824_v33 }
0x1428   : > { %v3100_v59 = vmul.f32 0.3275911, %v3098_v57  ;;  %v3099_v60 = vand.u32 2147483647, %v3093_v58  ;;  %v3126_v63 = vsub.f32 0.0, %v3098_v57  ;;  %vm3095_vm13 = vcmp.ge.f32.partialorder %v3093_v58, 0.0 }
0x1429   : > { %v3097_v51 = vsel %vm3095_vm13, 1.0, %v4824_v33  ;;  %v3237_v58 = vld [vmem:[%s5620_s17] sm:$0x3] (!%p4167_p5)  ;;  %s5621_s17 = sld [smem:[#allocation19_spill]] (!%p4167_p5) }
0x142a   : > { %v3102_v61 = vadd.f32 1.0, %v3100_v59  ;;  %v3101_v48 = vmul.f32 0.3275911, %v3099_v60  ;;  %v3127_v0 = vsub.f32 0.0, %v3099_v60  ;;  %v3128_v19 = vmul.f32 %v3126_v63, %v3098_v57 }
0x142b   : > { %v4825_v59 = vmov (!%p4167_p5), 0.0|0.0  }
0x142c   : > { %4725 = vrcp.f32 %v3102_v61  ;;  %v3103_v62 = vadd.f32 1.0, %v3101_v48  ;;  %v3129_v22 = vmul.f32 %v3127_v0, %v3099_v60  ;;  %v3130_v7 = vmul.f32 1.442695, %v3128_v19  ;;  %4623 = vmatprep.subr.bf16.mxu0 (!%p4167_p5), %v4825_v59  ;;  %v4735_v19 = vld [vmem:[%s5580_s19 + $0x4] ss:$16 sps:$4 sm:$0xff] (!%p4167_p5)  }
0x142d   : > { %3416 = vmatprep.subr.bf16.mxu1 (!%p4167_p5), %v4735_v19  ;;  %v3351_v59 = vld [vmem:[%s5624_s24] sm:$0xf] (!%p4167_p5) }
0x142e   : > { %4727 = vrcp.f32 %v3103_v62  ;;  %v3132_v12 = vmul.f32 1.442695, %v3129_v22  ;;  %v4741_v22 = vld [vmem:[%s5580_s19 + $0x24] ss:$16 sps:$4 sm:$0xff] (!%p4167_p5)  }
0x142f   : > { %4729 = vpow2.f32 %v3130_v7  ;;  %v4745_v7 = vld [vmem:[%s5580_s19 + $0x2c] ss:$16 sps:$4 sm:$0xff] (!%p4167_p5)   ;;  %v4755_v33 = vld [vmem:[%s5621_s17 + $0x50] sm:$0xff] (!%p4167_p5)  }
0x1430   : > { %4731 = vpow2.f32 %v3132_v12  ;;  %v4748_v12 = vld [vmem:[%s5621_s17 + $0xc0] sm:$0xff] (!%p4167_p5)  }
0x1436   : > { %v4726_v1 = vpop.eup %4725 }
0x1437   : > { %v3108_v2 = vmul.f32 1.0614054, %v4726_v1 }
0x1438   : > { %v4728_v3 = vpop.eup %4727 }
0x1439   : > { %v3110_v5 = vadd.f32 -1.4531521, %v3108_v2  ;;  %v3109_v8 = vmul.f32 1.0614054, %v4728_v3  ;;  %v4730_v24 = vpop.eup %4729  ;;  %v4737_v2 = vld [vmem:[%s5580_s19 + $0x8] ss:$16 sps:$4 sm:$0xff] (!%p4167_p5)  }
0x143a   : > { %v4732_v29 = vpop.eup %4731 }
0x143b   : > { %v3112_v53 = vmul.f32 %v4726_v1, %v3110_v5  ;;  %v3111_v10 = vadd.f32 -1.4531521, %v3109_v8  ;;  %v4740_v5 = vld [vmem:[%s5580_s19] ss:$16 sps:$4 sm:$0xff] (!%p4167_p5)   ;;  %v4743_v8 = vld [vmem:[%s5580_s19 + $0x28] ss:$16 sps:$4 sm:$0xff] (!%p4167_p5)  }
0x143d   : > { %v3114_v11 = vadd.f32 1.4214138, %v3112_v53  ;;  %v3113_v31 = vmul.f32 %v4728_v3, %v3111_v10  ;;  %v4746_v53 = vld [vmem:[%s5580_s19 + $0x20] ss:$16 sps:$4 sm:$0xff] (!%p4167_p5)   ;;  %v4828_v10 = vmov (!%p4167_p5), 0  }
0x143f   : > { %v3116_v13 = vmul.f32 %v4726_v1, %v3114_v11  ;;  %v3115_v14 = vadd.f32 1.4214138, %v3113_v31  ;;  %v4747_v11 = vld [vmem:[%s5621_s17 + $0x40] sm:$0xff] (!%p4167_p5)  }
0x1441   : > { %v3118_v15 = vadd.f32 -0.28449672, %v3116_v13  ;;  %v3117_v16 = vmul.f32 %v4728_v3, %v3115_v14 }
0x1443   : > { %v3120_v17 = vmul.f32 %v4726_v1, %v3118_v15  ;;  %v3119_v18 = vadd.f32 -0.28449672, %v3117_v16  ;;  %v4169_v16 = vld [vmem:[%s5622_s20] ss:$0 sm:$0xff] (!%p4167_p5) }
0x1445   : > { %v3122_v20 = vadd.f32 0.2548296, %v3120_v17  ;;  %v3121_v21 = vmul.f32 %v4728_v3, %v3119_v18  ;;  %v4170_v18 = vld [vmem:[%s5623_s7] ss:$0 sm:$0xff] (!%p4167_p5) }
0x1447   : > { %v3124_v23 = vmul.f32 %v4726_v1, %v3122_v20  ;;  %v3123_v25 = vadd.f32 0.2548296, %v3121_v21 }
0x1449   : > { %v3134_v26 = vmul.f32 %v4730_v24, %v3124_v23  ;;  %v3125_v27 = vmul.f32 %v4728_v3, %v3123_v25  ;;  %v4739_v3 = vld [vmem:[%s5580_s19 + $0xc] ss:$16 sps:$4 sm:$0xff] (!%p4167_p5)   ;;  %v4749_v23 = vld [vmem:[%s5621_s17] sm:$0xff] (!%p4167_p5)  }
0x144a   : > { %v4750_v24 = vld [vmem:[%s5621_s17 + $0x80] sm:$0xff] (!%p4167_p5)  }
0x144b   : > { %v3136_v30 = vsub.f32 1.0, %v3134_v26  ;;  %v3135_v35 = vmul.f32 %v4732_v29, %v3125_v27  ;;  %v4751_v26 = vld [vmem:[%s5621_s17 + $0x48] sm:$0xff] (!%p4167_p5)  }
0x144c   : > { %v4752_v27 = vld [vmem:[%s5621_s17 + $0xc8] sm:$0xff] (!%p4167_p5)  }
0x144d   : > { %v3138_v36 = vmul.f32 %v3136_v30, %v3096_v34  ;;  %v3137_v37 = vsub.f32 1.0, %v3135_v35  ;;  %v4753_v29 = vld [vmem:[%s5621_s17 + $0x8] sm:$0xff] (!%p4167_p5)   ;;  %v4756_v34 = vld [vmem:[%s5621_s17 + $0xd0] sm:$0xff] (!%p4167_p5)  }
0x144e   : > { %v4754_v30 = vld [vmem:[%s5621_s17 + $0x88] sm:$0xff] (!%p4167_p5)   ;;  %v4757_v35 = vld [vmem:[%s5621_s17 + $0x10] sm:$0xff] (!%p4167_p5)  }
0x144f   : > { %v3140_v38 = vadd.f32 1.0, %v3138_v36  ;;  %v3139_v39 = vmul.f32 %v3137_v37, %v3097_v51  ;;  %v4758_v36 = vld [vmem:[%s5621_s17 + $0x90] sm:$0xff] (!%p4167_p5)   ;;  %v4759_v37 = vld [vmem:[%s5621_s17 + $0x58] sm:$0xff] (!%p4167_p5)  }
0x1450   : > { %v4760_v51 = vld [vmem:[%s5621_s17 + $0xd8] sm:$0xff] (!%p4167_p5)  }
0x1451   : > { %v3141_v41 = vadd.f32 1.0, %v3139_v39  ;;  %v3142_v43 = vmul.f32 %v3140_v38, %v3090_v55  ;;  %v4761_v38 = vld [vmem:[%s5621_s17 + $0x18] sm:$0xff] (!%p4167_p5)   ;;  %v4763_v55 = vld [vmem:[%s5621_s17 + $0x60] sm:$0xff] (!%p4167_p5)  }
0x1452   : > { %v4762_v39 = vld [vmem:[%s5621_s17 + $0x98] sm:$0xff] (!%p4167_p5)  }
0x1453   : > { %v3143_v44 = vmul.f32 %v3141_v41, %v3091_v40  ;;  %v4764_v40 = vld [vmem:[%s5621_s17 + $0xe0] sm:$0xff] (!%p4167_p5)  }
0x1454   : > { %v4765_v41 = vld [vmem:[%s5621_s17 + $0x20] sm:$0xff] (!%p4167_p5)  }
0x1455   : > { %v3144_v45 = vpack.c.bf16 %v3143_v44, %v3142_v43  ;;  %v4766_v43 = vld [vmem:[%s5621_s17 + $0xa0] sm:$0xff] (!%p4167_p5)   ;;  %v4767_v44 = vld [vmem:[%s5621_s17 + $0x68] sm:$0xff] (!%p4167_p5)  }
0x1457   : > { %4605 = vmatmul.mubr.msk.bf16.vlgmr.msra.gmra.mrb[64].mxu1 %vm3184_vm14, %v3144_v45  ;;  %v4768_v45 = vld [vmem:[%s5621_s17 + $0xe8] sm:$0xff] (!%p4167_p5)  }
0x1458   : > { %3417 = vmatpush1.bf16.msra.mxu1 (!%p4167_p5), %v4740_v5  ;;  %3448 = vmatprep.mubr.bf16.mxu1 (!%p4167_p5), %v4828_v10 }
0x1459   : > { %3418 = vmatprep.subr.bf16.mxu1 (!%p4167_p5), %v4741_v22 }
0x145c   : > { %3419 = vmatpush1.bf16.msra.mxu1 (!%p4167_p5), %v4746_v53 }
0x145d   : > { %4315 = vmatprep.subr.bf16.mxu1 (!%p4167_p5), %v4747_v11 }
0x152a   : > { %v3222_v47 = vpop.f32.mrb[64].mxu1 }
0x152b   : > { %v3223_v50 = vadd.f32 %v4161_v46, %v3222_v47  ;;  %v4606_v54 = vpop.f32.mrb[65].mxu1  ;;  %3236 = sbr.rel (%p4167_p5) target bundleno = 6397 (0x18fd), region = 120  ;;  %v4770_v47 = vld [vmem:[%s5621_s17 + $0xa8] sm:$0xff] (!%p4167_p5)  }
0x152c   : > { %v3225_v28 = vpop.f32.mrb[66].mxu1  ;;  %v4772_v54 = vld [vmem:[%s5621_s17 + $0xf0] sm:$0xff] (!%p4167_p5)  }
0x152d   : > { %v3229_v32 = vadd.f32 %v3223_v50, %v5346_v6  ;;  %v3226_v56 = vadd.f32 %v4161_v46, %v3225_v28  ;;  %v4607_v52 = vpop.f32.mrb[67].mxu1  ;;  %v4827_v6 = vmov (!%p4167_p5), 0.0   ;;  %v4769_v46 = vld [vmem:[%s5621_s17 + $0x28] sm:$0xff] (!%p4167_p5)   ;;  %v4771_v50 = vld [vmem:[%s5621_s17 + $0x70] sm:$0xff] (!%p4167_p5)  }
0x152e   : > { %4612 = vmatprep.mubr.msk.f32.mxu0 (!%p4167_p5), %vm4826_vm15, %v4827_v6  ;;  %v4773_v28 = vld [vmem:[%s5621_s17 + $0x30] sm:$0xff] (!%p4167_p5)   ;;  %v4776_v52 = vld [vmem:[%s5621_s17 + $0xf8] sm:$0xff] (!%p4167_p5)   ;;  %v3359_v6 = vsub.s32 (!%p4167_p5), 1, %v5112_v42 }
0x152f   : > { %3231 = vst.msk [vmem:[#allocation2] sm:$0xff] %vm1042_vm7, %v3229_v32  ;;  %v3230_v4 = vadd.f32 %v3226_v56, %v5348_v9  ;;  %v4775_v56 = vld [vmem:[%s5621_s17 + $0x78] sm:$0xff] (!%p4167_p5)  }
0x1531   : > { %3232 = vst.msk [vmem:[#allocation2 + $0x8] sm:$0xff] %vm1042_vm7, %v3230_v4  ;;  %v4624_v57 = vpack.c.bf16 (!%p4167_p5), %v3230_v4, %v3229_v32  ;;  %v4774_v32 = vld [vmem:[%s5621_s17 + $0xb0] sm:$0xff] (!%p4167_p5)   ;;  %v4777_v4 = vld [vmem:[%s5621_s17 + $0x38] sm:$0xff] (!%p4167_p5)  }
0x1533   : > { %4625 = vmatpush3.bf16.msra.mxu0 %v4624_v57  ;;  %v4778_v57 = vld [vmem:[%s5621_s17 + $0xb8] sm:$0xff]  }
0x1534   : > { %3457 = vmatprep.subr.bf16.mxu0 %v4739_v3 }
0x1536   : > { %4613 = vmatmul.mubr.msk.f32.vlgmr.msra.gmra.mrb[0].mxu0 %vm3238_vm0, %v3237_v58  ;;  %v3363_v58 = vsub.s32 2, %v5112_v42 }
0x1537   : > { %3458 = vmatpush1.bf16.msra.mxu0 %v4737_v2  ;;  %3489 = vmatprep.mubr.bf16.mxu0 %v4828_v10 }
0x1538   : > { %3459 = vmatprep.subr.bf16.mxu0 %v4745_v7 }
0x153b   : > { %3460 = vmatpush1.bf16.msra.mxu0 %v4743_v8 }
0x153c   : > { %4337 = vmatprep.subr.bf16.mxu0 %v4748_v12 }
0x1609   : > { %v3308_v9 = vpop.f32.mrb[0].mxu0 }
0x160a   : > { %v4614_v60 = vpop.f32.mrb[1].mxu0  ;;  %v3315_v61 = vsel %vm3314_vm1, %v3308_v9, 0.0 }
0x160b   : > { %3316 = vadd.xlane.f32.xlu0 %v3315_v61  ;;  %v3356_v60 = vrot.slane %v3351_v59, %v5117_v49  ;;  %v3364_v61 = vrot.slane %v3351_v59, %v3363_v58 }
0x1698   : > { %v3317_v48 = vpop.xlane.xlu0 %3316 }
0x1699   : > { %v3318_v62 = vmul.f32 0.03125, %v3317_v48  ;;  %v3360_v48 = vrot.slane %v3351_v59, %v3359_v6 }
0x169b   : > { %v3319_v63 = vsub.f32 %v3308_v9, %v3318_v62  ;;  %v3367_v9 = vsub.s32 3, %v5112_v42 }
0x169d   : > { %v3320_v0 = vmul.f32 %v3319_v63, %v3319_v63  ;;  %v3368_v62 = vrot.slane %v3351_v59, %v3367_v9 }
0x169f   : > { %v3321_v1 = vsel %vm3314_vm1, %v3320_v0, 0.0 }
0x16a0   : > { %3322 = vadd.xlane.f32.xlu0 %v3321_v1 }
0x172d   : > { %v3323_v31 = vpop.xlane.xlu0 %3322 }
0x172e   : > { %v3324_v13 = vmul.f32 0.03125, %v3323_v31 }
0x1730   : > { %v3325_v14 = vadd.f32 1e-05, %v3324_v13 }
0x1732   : > { %4779 = vrsqrt.f32 %v3325_v14 }
0x173c   : > { %v4780_v15 = vpop.eup %4779 }
0x173d   : > { %v3327_v17 = vmul.f32 %v4780_v15, %v3319_v63 }
0x173f   : > { %v3334_v20 = vmul.f32 %v4169_v16, %v3327_v17 }
0x1741   : > { %v3341_v21 = vadd.f32 %v4170_v18, %v3334_v20  ;;  %v4181_v18 = vld [vmem:[%s5625_s3] ss:$0 sm:$0xff] }
0x1743   : > { %v3342_v25 = vpack.c.bf16 %v3341_v21, %v3341_v21 }
0x1745   : > { %4179 = vmatmul.mubr.msk.bf16.vlgmr.msra.gmra.mrb[0].mxu1 %vm1042_vm7, %v3342_v25  ;;  %4180 = vmatmul.mubr.msk.bf16.vlgmr.msra.gmra.mrb[4].mxu0 %vm1042_vm7, %v3342_v25 }
0x1746   : > { %4316 = vmatpush3.bf16.msra.mxu1 %v4749_v23  ;;  %4338 = vmatpush3.bf16.msra.mxu0 %v4750_v24 }
0x1747   : > { %4317 = vmatprep.subr.bf16.mxu1 %v4751_v26  ;;  %4339 = vmatprep.subr.bf16.mxu0 %v4752_v27 }
0x174a   : > { %4318 = vmatpush3.bf16.msra.mxu1 %v4753_v29  ;;  %4340 = vmatpush3.bf16.msra.mxu0 %v4754_v30 }
0x174b   : > { %4319 = vmatprep.subr.bf16.mxu1 %v4755_v33  ;;  %4341 = vmatprep.subr.bf16.mxu0 %v4756_v34 }
0x174e   : > { %4320 = vmatpush3.bf16.msra.mxu1 %v4757_v35  ;;  %4342 = vmatpush3.bf16.msra.mxu0 %v4758_v36 }
0x174f   : > { %4321 = vmatprep.subr.bf16.mxu1 %v4759_v37  ;;  %4343 = vmatprep.subr.bf16.mxu0 %v4760_v51 }
0x1752   : > { %4322 = vmatpush3.bf16.msra.mxu1 %v4761_v38  ;;  %4344 = vmatpush3.bf16.msra.mxu0 %v4762_v39 }
0x1753   : > { %4323 = vmatprep.subr.bf16.mxu1 %v4763_v55  ;;  %4345 = vmatprep.subr.bf16.mxu0 %v4764_v40 }
0x1756   : > { %4324 = vmatpush3.bf16.msra.mxu1 %v4765_v41  ;;  %4346 = vmatpush3.bf16.msra.mxu0 %v4766_v43 }
0x1757   : > { %4325 = vmatprep.subr.bf16.mxu1 %v4767_v44  ;;  %4347 = vmatprep.subr.bf16.mxu0 %v4768_v45 }
0x175a   : > { %4326 = vmatpush3.bf16.msra.mxu1 %v4769_v46  ;;  %4348 = vmatpush3.bf16.msra.mxu0 %v4770_v47 }
0x175b   : > { %4327 = vmatprep.subr.bf16.mxu1 %v4771_v50  ;;  %4349 = vmatprep.subr.bf16.mxu0 %v4772_v54 }
0x175e   : > { %4328 = vmatpush3.bf16.msra.mxu1 %v4773_v28  ;;  %4350 = vmatpush3.bf16.msra.mxu0 %v4774_v32 }
0x175f   : > { %4329 = vmatprep.subr.bf16.mxu1 %v4775_v56  ;;  %4351 = vmatprep.subr.bf16.mxu0 %v4776_v52 }
0x1762   : > { %4330 = vmatpush3.bf16.msra.mxu1 %v4777_v4  ;;  %4352 = vmatpush3.bf16.msra.mxu0 %v4778_v57 }
0x1818   : > { %v3450_v63 = vpop.f32.mrb[0].mxu1  ;;  %v3491_v0 = vpop.f32.mrb[4].mxu0 }
0x1819   : > { %v3451_v1 = vadd.f32 %v3450_v63, %v3356_v60  ;;  %v3492_v19 = vadd.f32 %v3491_v0, %v3364_v61  ;;  %v3452_v2 = vpop.f32.mrb[1].mxu1  ;;  %v3493_v3 = vpop.f32.mrb[5].mxu0 }
0x181a   : > { %v3453_v5 = vadd.f32 %v3452_v2, %v3360_v48  ;;  %v3494_v22 = vadd.f32 %v3493_v3, %v3368_v62  ;;  %v3454_v7 = vpop.f32.mrb[2].mxu1  ;;  %v3495_v8 = vpop.f32.mrb[6].mxu0 }
0x181b   : > { %v3498_v53 = vmax.f32 %v3451_v1, 0.0  ;;  %v3500_v10 = vmax.f32 %v3492_v19, 0.0  ;;  %v3455_v11 = vpop.f32.mrb[3].mxu1  ;;  %v3496_v12 = vpop.f32.mrb[7].mxu0 }
0x181c   : > { %v3499_v42 = vmax.f32 %v3453_v5, 0.0  ;;  %v3501_v31 = vmax.f32 %v3494_v22, 0.0 }
0x181d   : > { %v3502_v14 = vpack.c.bf16 %v3498_v53, %v3498_v53  ;;  %v3504_v15 = vpack.c.bf16 %v3500_v10, %v3500_v10 }
0x181e   : > { %v3503_v49 = vpack.c.bf16 %v3499_v42, %v3499_v42  ;;  %v3505_v13 = vpack.c.bf16 %v3501_v31, %v3501_v31 }
0x1820   : > { %3801 = vmatprep.mubr.bf16.mxu1 %v3503_v49  ;;  %3841 = vmatprep.mubr.bf16.mxu0 %v3505_v13 }
0x1821   : > { %3802 = vmatmul.mubr.bf16.vlgmr.msra.gmra.mrb[4].mxu1 %v3502_v14  ;;  %3842 = vmatmul.mubr.bf16.vlgmr.msra.gmra.mrb[8].mxu0 %v3504_v15 }
0x18f4   : > { %v4331_v16 = vpop.f32.mrb[4].mxu1  ;;  %v4353_v17 = vpop.f32.mrb[8].mxu0 }
0x18f5   : > { %v4332_v20 = vpop.f32.mrb[5].mxu1  ;;  %v4354_v21 = vpop.f32.mrb[9].mxu0 }
0x18f6   : > { %v4333_v23 = vadd.f32 %v4332_v20, %v4331_v16  ;;  %v4355_v24 = vadd.f32 %v4354_v21, %v4353_v17  ;;  %v4334_v25 = vpop.f32.mrb[6].mxu1  ;;  %v4356_v26 = vpop.f32.mrb[10].mxu0 }
0x18f7   : > { %v4335_v27 = vpop.f32.mrb[7].mxu1  ;;  %v4357_v29 = vpop.f32.mrb[11].mxu0 }
0x18f8   : > { %v3804_v30 = vadd.f32 %v4333_v23, %v4181_v18 }
0x18fa   : > { %v3844_v33 = vadd.f32 %v4355_v24, %v3804_v30 }
0x18fc   : > { %3849 = vst [vmem:[#allocation3] sm:$0x3] %v3844_v33 }
0x18fd PF: > { %p4632_p6 = scmp.eq.s32.totalorder %s4956_s30, 1  ;;  %s4829_s26 = smov [#allocation3]  }
0x18fe   : > { %s3857_s2 = sshll.u32 %s4829_s26, 4  ;;  %s3858_s2 = int_to_ptr.vmem [resolvable:$true] %s3857_s2 }
0x18ff   : > { %s4781_s20 = scalar_lea.vmem %s3858_s2, 32  ;;  %p4788_p10 = scmp.lt.s32.totalorder %s3858_s2, %s3858_s2 }
0x1900   : > { %p4782_p7 = scmp.ne.s32.totalorder %s3858_s2, %s4781_s20  ;;  %p4789_p11 = scmp.lt.s32.totalorder %s4781_s20, %s4781_s20 }
0x1902   : > { %p4783_p8 = pnand %p4782_p7, %p4632_p6  ;;  %p4790_p12 = por %p4789_p11, %p4788_p10 }
0x1904   : > { %p4784_p9 = pneg %p4783_p8 }
0x1906   : > { %p4791_p13 = pnand %p4790_p12, %p4784_p9 }
0x1908   : > { %4794 = shalt.err (!%p4791_p13)
}
0x1909   : > { %s5626_s7 = sld [smem:[#allocation21_spill]] }
0x190f   : > { %s4795_s27 = scalar_lea.hbm %s5626_s7, 32 }
0x1910   : > { %p4796_p0 = scmp.ne.s32.totalorder %s5626_s7, %s4795_s27  ;;  %p4801_p3 = scmp.lt.u32.totalorder %s4795_s27, %s5626_s7 }
0x1912   : > { %p4797_p1 = pnand %p4796_p0, %p4632_p6 }
0x1914   : > { %p4798_p2 = pneg %p4797_p1 }
0x1916   : > { %p4803_p4 = pnand %p4801_p3, %p4798_p2 }
0x1918   : > { %4806 = shalt.err (!%p4803_p4)
}
0x1919   : > { %4629 = dma.vmem_to_hbm [thread:$0]  (%p4632_p6), %s3858_s2, 32, %s5626_s7, [#allocation4]  }
0x191a   : > { %4812 = dma.done.wait (%p4632_p6), [#allocation4], 32  }
0x191b   : > { %4814 = vsyncadd (%p4632_p6), [#allocation4], 4294967264 }
0x191c PF: > { %s5627_s29 = sld [smem:[#allocation6_spill]] }
0x1922   : > { %s34_s4 = sadd.s32 1, %s5627_s29  }
0x1923   : > { %p31_p5 = scmp.ge.s32.totalorder %s34_s4, 4  }
0x1925   :  { %33 = sbr.rel (!%p31_p5) target bundleno = 17 (0x11), region = 205 }
0x192c   :  { %3870 = vsyncpa [#allocation4], 1 }
0x192d   :  { %3872 = vsyncpa [#allocation4 + $0x1], 1 }

</bundles_post_ra>
